<compile_context>
chip_gen: v6e
topology: v6e:2x2x1
jax: 0.10.0
libtpu: 0.0.40
codegen_flags: <defaults>
</compile_context>

<pallas_src>
import functools

import jax
import jax.numpy as jnp
from jax import lax
from jax.experimental import pallas as pl
from jax.experimental.pallas import tpu as pltpu


def _qrdqn_td_kernel(q_ref, nq_ref, scal_ref, tauhat_ref, g1_ref, g2_ref,
                     bell_ref, red_ref, *out_refs, tau, with_aux):
    """One batch tile of TB samples.

    q_ref, nq_ref : (TB, N*tau) f32    lane-dense flatten of (TB, N, tau)
    scal_ref      : (TB, 4) f32        [action, next_n_action, n-step reward,
                                        value_gamma*(1-done)]  (actions as floats)
    tauhat_ref    : (1, tau*tau) f32   flat l=i*tau+j -> (i+0.5)/tau
    g1_ref        : (N*tau, 2*tau)     [m,c] = (c <  tau) & (m % tau == c)
    g2_ref        : (N*tau, 2*tau)     [m,c] = (c >= tau) & (m % tau == c-tau)
    bell_ref      : (2*tau, tau*tau)   [c,l] = +1 if c==tau+(l%tau), -1 if c==l//tau
    red_ref       : (tau*tau, PW)      [l,i] = (i < tau) & (l//tau == i)
    outputs: packed (TB, PW)  [grad in lanes [0,tau), td in lane tau],
             [be (TB, tau*tau), qh (TB, tau*tau)] if with_aux.
    """
    if with_aux:
        packed_ref, be_ref, qh_ref = out_refs
    else:
        (packed_ref,) = out_refs

    f32 = jnp.float32
    # 0/+-1 selection matmuls are exact at HIGHEST (every weight lives entirely
    # in the first bf16 chunk; exactly one non-zero term per output element of
    # the gathers / reduce, and a single +/- pair for the bellman matmul).
    hi = lax.Precision.HIGHEST
    NT = q_ref.shape[-1]
    PW = packed_ref.shape[-1]
    inv_tau = 1.0 / tau

    scal = scal_ref[...]
    a_lo = scal[:, 0:1].astype(jnp.int32) * tau            # action*tau  (TB, 1)
    na_lo = scal[:, 1:2].astype(jnp.int32) * tau
    rew = scal[:, 2:3]                                     # n-step discounted reward
    coef = scal[:, 3:4]                                    # value_gamma * (1 - done)

    # ---- action one-hot masks over the lane-flattened (N*tau) layout (iota) ----
    lane = lax.broadcasted_iota(jnp.int32, (1, NT), 1)
    mask_a = ((lane >= a_lo) & (lane < a_lo + tau)).astype(f32)      # (TB, NT)
    mask_na = ((lane >= na_lo) & (lane < na_lo + tau)).astype(f32)

    # ---- gather: q[b, a, :] -> cols [0,tau), next_n_q[b, na, :] -> cols [tau,2tau)
    gathered = (jnp.dot(q_ref[...] * mask_a, g1_ref[...],
                        preferred_element_type=f32, precision=hi)
                + jnp.dot(nq_ref[...] * mask_na, g2_ref[...],
                          preferred_element_type=f32, precision=hi))  # (TB, 2*tau)

    # ---- fold bellman target (rew + coef*tq) into the right half: [q_s_a | target]
    is_t = lax.broadcasted_iota(jnp.int32, (1, 2 * tau), 1) >= tau
    lhs = gathered * jnp.where(is_t, coef, 1.0) + jnp.where(is_t, rew, 0.0)

    # ---- fused tile/repeat: u[b, i*tau+j] = target[b,j] - q_s_a[b,i]  (one matmul)
    u = jnp.dot(lhs, bell_ref[...], preferred_element_type=f32, precision=hi)  # (TB, tau*tau)
    if with_aux:
        be_ref[...] = u.astype(be_ref.dtype)

    # ---- quantile Huber loss (smooth_l1, beta = 1) ----
    abs_u = jnp.abs(u)
    huber = jnp.where(abs_u < 1.0, 0.5 * u * u, abs_u - 0.5)
    th = tauhat_ref[...]
    qw = jnp.where(u < 0.0, 1.0 - th, th)                  # == |tau_hat - 1{u<0}|
    qh = huber * qw
    if with_aux:
        qh_ref[...] = qh.astype(qh_ref.dtype)

    # ---- packed per-sample outputs: grad in lanes [0,tau), td in lane tau ----
    # grad_buf[b, i] = d td_err_per_sample[b] / d q_s_a[b, i]
    # NOTE: deliberately excludes the per-sample weight and the 1/B of the final
    # mean (as in the hpc kernel); any backward consuming it must apply them.
    g = qw * jnp.clip(u, -1.0, 1.0)
    grad_pad = jnp.dot(g, red_ref[...], preferred_element_type=f32, precision=hi)  # (TB, PW)
    td = jnp.sum(qh, axis=1, keepdims=True)                                        # (TB, 1)
    col = lax.broadcasted_iota(jnp.int32, (1, PW), 1)
    td_col = jnp.where(col == tau, inv_tau, 0.0).astype(f32)                       # (1, PW)
    packed_ref[...] = grad_pad * (-inv_tau) + td * td_col   # one unmasked lane-dense store


def qrdqn_nstep_td_error(q, next_n_q, action, next_n_action, reward, done,
                         gamma, weight=None, value_gamma=None,
                         with_aux=True, aux_dtype=jnp.float32, block_b=None):
    """Forward pass. Returns (loss(1,), td(B,), bellman_err(B,tau,tau),
    quantile_huber_loss(B,tau,tau), grad_buf(B,tau)); the two (B,tau,tau)
    buffers are None when with_aux=False."""
    f32 = jnp.float32
    B, N, tau = q.shape
    T = reward.shape[0]
    NT = N * tau
    TT = tau * tau
    PW = ((tau + 1 + 127) // 128) * 128        # packed [grad | td] lane width

    if weight is None:
        weight = jnp.ones((B,), f32)
    if value_gamma is None:
        value_gamma = jnp.full((B,), float(gamma) ** T, f32)   # module default

    # --- per-sample scalars, packed into ONE lane-dense (B, 4) f32 input ---
    rf = float(gamma) ** jnp.arange(T, dtype=f32)                        # gamma^t
    r_nstep = jnp.sum(reward.astype(f32) * rf[:, None], axis=0)          # (B,)
    coef = value_gamma.astype(f32) * (1.0 - done.astype(f32))            # (B,)
    scal = jnp.stack([action.astype(f32), next_n_action.astype(f32),
                      r_nstep, coef], axis=1)                            # (B, 4)

    q2 = q.astype(f32).reshape(B, NT)            # free contiguous reshape, lane-dense
    nq2 = next_n_q.astype(f32).reshape(B, NT)

    # --- constant 0/+-1 selection matrices (constant index_map: DMA'd once) ---
    m_mod = jnp.arange(NT, dtype=jnp.int32) % tau
    c2 = jnp.arange(2 * tau, dtype=jnp.int32)
    g1 = ((c2[None, :] < tau) & (m_mod[:, None] == c2[None, :])).astype(f32)          # (NT, 2tau)
    g2 = ((c2[None, :] >= tau) & (m_mod[:, None] == (c2[None, :] - tau))).astype(f32)  # (NT, 2tau)
    lidx = jnp.arange(TT, dtype=jnp.int32)
    i_of_l = lidx // tau
    j_of_l = lidx % tau
    bell = ((c2[:, None] == (tau + j_of_l)[None, :]).astype(f32)
            - (c2[:, None] == i_of_l[None, :]).astype(f32))                           # (2tau, TT)
    pw_idx = jnp.arange(PW, dtype=jnp.int32)
    red = ((pw_idx[None, :] < tau)
           & (i_of_l[:, None] == pw_idx[None, :])).astype(f32)                        # (TT, PW)
    tau_hat = ((i_of_l.astype(f32) + 0.5) / tau).reshape(1, TT)

    # --- batch tile: keep >= ~4 grid steps when B allows (v7x megacore +
    #     pipelining), larger tile budget on 128-MiB-VMEM chips (v5e/v6e) ---
    itemsize_aux = jnp.dtype(aux_dtype).itemsize
    per_row = 4 * (2 * NT + 4 + PW) + (2 * TT * itemsize_aux if with_aux else 0)
    try:
        vmem_cap = int(pltpu.get_tpu_info().vmem_capacity_bytes)
    except Exception:
        vmem_cap = 64 * 1024 * 1024            # conservative (v7x-sized)

    if block_b is None:
        budget = (16 << 20) if vmem_cap > (96 << 20) else (6 << 20)
        tb = budget // max(per_row, 1)
        tb = min(tb, max(8, B // 4), 1024)
        TB = max(8, (tb // 8) * 8)
    else:
        TB = max(8, (int(block_b) // 8) * 8)

    const_bytes = 2 * 4 * (2 * NT * 2 * tau + 2 * tau * TT + TT * PW + TT)
    cap = max(vmem_cap - (8 << 20), 16 << 20)
    if const_bytes > cap:
        raise ValueError(
            f"tau={tau}: O(tau^3) selection constants ({const_bytes/2**20:.1f} MiB "
            f"double-buffered) exceed usable VMEM ({cap/2**20:.1f} MiB).")

    def footprint(tb):
        tiles = 2 * (4 * tb * (2 * NT + 4 + PW)
                     + (2 * itemsize_aux * tb * TT if with_aux else 0))
        live = 4 * tb * (2 * NT + 6 * TT + 2 * PW)   # rough in-flight vregs / spill
        return const_bytes + tiles + live

    while footprint(TB) > cap and TB > 8:
        TB = max(8, ((TB // 2) // 8) * 8)
    vmem_limit = int(min(max(footprint(TB) + (4 << 20), 32 << 20), cap))

    row = lambda b: (b, 0)
    const = lambda b: (0, 0)
    in_specs = [
        pl.BlockSpec((TB, NT), row),          # q (B, N*tau)
        pl.BlockSpec((TB, NT), row),          # next_n_q
        pl.BlockSpec((TB, 4), row),           # packed per-sample scalars
        pl.BlockSpec((1, TT), const),         # tau_hat (flat)
        pl.BlockSpec((NT, 2 * tau), const),   # gather -> cols [0,tau)
        pl.BlockSpec((NT, 2 * tau), const),   # gather -> cols [tau,2tau)
        pl.BlockSpec((2 * tau, TT), const),   # fused tile/repeat (+-1)
        pl.BlockSpec((TT, PW), const),        # per-i reduce into packed lanes
    ]
    out_shape = [jax.ShapeDtypeStruct((B, PW), f32)]
    out_specs = [pl.BlockSpec((TB, PW), row)]
    if with_aux:
        out_shape += [jax.ShapeDtypeStruct((B, TT), aux_dtype),
                      jax.ShapeDtypeStruct((B, TT), aux_dtype)]
        out_specs += [pl.BlockSpec((TB, TT), row), pl.BlockSpec((TB, TT), row)]

    outs = pl.pallas_call(
        functools.partial(_qrdqn_td_kernel, tau=tau, with_aux=with_aux),
        grid=(pl.cdiv(B, TB),),               # ragged last block: no wrapper padding
        in_specs=in_specs,
        out_specs=tuple(out_specs),
        out_shape=tuple(out_shape),
        compiler_params=pltpu.CompilerParams(
            dimension_semantics=("parallel",),
            vmem_limit_bytes=vmem_limit),
    )(q2, nq2, scal, tau_hat, g1, g2, bell, red)

    packed = outs[0]
    grad = packed[:, :tau]                    # (B, tau)
    td = packed[:, tau]                       # (B,)
    if with_aux:
        be = outs[1].reshape(B, tau, tau)     # free contiguous reshape
        qh = outs[2].reshape(B, tau, tau)
    else:
        be = qh = None

    # scalar loss is the only cross-batch dependency -> trivial wrapper-side mean
    loss = jnp.mean(td * weight.astype(f32)).reshape(1)
    return loss, td, be, qh, grad


def _reference(q, nq, a, na, reward, done, gamma, weight, value_gamma):
    """Pure-JAX mirror of the same math (correctness check)."""
    f32 = jnp.float32
    B, N, tau = q.shape
    T = reward.shape[0]
    rf = float(gamma) ** jnp.arange(T, dtype=f32)
    r = jnp.sum(reward.astype(f32) * rf[:, None], axis=0)
    coef = value_gamma.astype(f32) * (1.0 - done.astype(f32))
    q_s_a = q[jnp.arange(B), a, :].astype(f32)
    tq = nq[jnp.arange(B), na, :].astype(f32)
    target = r[:, None] + coef[:, None] * tq
    u = target[:, None, :] - q_s_a[:, :, None]                 # (B, tau_i, tau_j)
    abs_u = jnp.abs(u)
    huber = jnp.where(abs_u < 1.0, 0.5 * u * u, abs_u - 0.5)
    tau_hat = (jnp.arange(tau, dtype=f32) + 0.5) / tau
    qw = jnp.abs(tau_hat[None, :, None] - (u < 0.0).astype(f32))
    qh = huber * qw
    td = jnp.sum(qh, axis=2).mean(axis=1)
    loss = jnp.mean(td * weight.astype(f32))
    grad = -jnp.sum(qw * jnp.clip(u, -1.0, 1.0), axis=2) / tau
    return loss, td, u, qh, grad


if __name__ == "__main__":
    tau, T, B, N = 16, 4, 8, 4
    gamma = 0.99

    key = jax.random.PRNGKey(0)
    k1, k2, k3, k4, k5, k6 = jax.random.split(key, 6)
    q = jax.random.normal(k1, (B, N, tau), jnp.float32)
    next_n_q = jax.random.normal(k2, (B, N, tau), jnp.float32)
    action = jax.random.randint(k3, (B,), 0, N)
    next_n_action = jax.random.randint(k4, (B,), 0, N)
    reward = jax.random.normal(k5, (T, B), jnp.float32)
    done = (jax.random.uniform(k6, (B,)) < 0.3).astype(jnp.float32)
    weight = jnp.ones((B,), jnp.float32)
    value_gamma = jnp.full((B,), gamma ** T, jnp.float32)

    loss, td, be, qh, grad = qrdqn_nstep_td_error(
        q, next_n_q, action, next_n_action, reward, done, gamma,
        weight=weight, value_gamma=value_gamma)
    jax.block_until_ready((loss, td, be, qh, grad))

    ref_loss, ref_td, ref_be, ref_qh, ref_grad = _reference(
        q, next_n_q, action, next_n_action, reward, done, gamma, weight, value_gamma)

    assert loss.shape == (1,) and td.shape == (B,)
    assert be.shape == (B, tau, tau) and qh.shape == (B, tau, tau) and grad.shape == (B, tau)
    assert jnp.allclose(loss[0], ref_loss, atol=1e-5, rtol=1e-5), (loss, ref_loss)
    assert jnp.allclose(td, ref_td, atol=1e-5, rtol=1e-5)
    assert jnp.allclose(be, ref_be, atol=1e-5, rtol=1e-5)
    assert jnp.allclose(qh, ref_qh, atol=1e-5, rtol=1e-5)
    assert jnp.allclose(grad, ref_grad, atol=1e-5, rtol=1e-5)

    # exercise the multi-step grid with a RAGGED last block (no padding) + aux path
    B2 = 20
    kk = jax.random.split(jax.random.PRNGKey(1), 6)
    q_b = jax.random.normal(kk[0], (B2, N, tau), jnp.float32)
    nq_b = jax.random.normal(kk[1], (B2, N, tau), jnp.float32)
    a_b = jax.random.randint(kk[2], (B2,), 0, N)
    na_b = jax.random.randint(kk[3], (B2,), 0, N)
    rew_b = jax.random.normal(kk[4], (T, B2), jnp.float32)
    done_b = (jax.random.uniform(kk[5], (B2,)) < 0.3).astype(jnp.float32)
    w_b = jnp.ones((B2,), jnp.float32)
    vg_b = jnp.full((B2,), gamma ** T, jnp.float32)

    loss2, td2, be2, qh2, grad2 = qrdqn_nstep_td_error(
        q_b, nq_b, a_b, na_b, rew_b, done_b, gamma,
        weight=w_b, value_gamma=vg_b, with_aux=True)
    jax.block_until_ready((loss2, td2, be2, qh2, grad2))
    r_loss2, r_td2, r_be2, r_qh2, r_grad2 = _reference(
        q_b, nq_b, a_b, na_b, rew_b, done_b, gamma, w_b, vg_b)
    assert jnp.allclose(loss2[0], r_loss2, atol=1e-5, rtol=1e-5)
    assert jnp.allclose(td2, r_td2, atol=1e-5, rtol=1e-5)
    assert jnp.allclose(be2, r_be2, atol=1e-5, rtol=1e-5)
    assert jnp.allclose(qh2, r_qh2, atol=1e-5, rtol=1e-5)
    assert jnp.allclose(grad2, r_grad2, atol=1e-5, rtol=1e-5)

    # aux-free variant with an explicit small block (also a ragged last block)
    loss3, td3, _, _, grad3 = qrdqn_nstep_td_error(
        q_b, nq_b, a_b, na_b, rew_b, done_b, gamma,
        weight=w_b, value_gamma=vg_b, with_aux=False, block_b=8)
    jax.block_until_ready((loss3, td3, grad3))
    assert jnp.allclose(loss3[0], r_loss2, atol=1e-5, rtol=1e-5)
    assert jnp.allclose(td3, r_td2, atol=1e-5, rtol=1e-5)
    assert jnp.allclose(grad3, r_grad2, atol=1e-5, rtol=1e-5)

    print("KERNEL_OK")
</pallas_src>

<mosaic_0001>
module attributes {stable_mosaic.version = 11 : i64} {
  func.func @_qrdqn_td_kernel(%arg0: i32, %arg1: memref<8x64xf32, #tpu.memory_space<vmem>>, %arg2: memref<8x64xf32, #tpu.memory_space<vmem>>, %arg3: memref<8x4xf32, #tpu.memory_space<vmem>>, %arg4: memref<1x256xf32, #tpu.memory_space<vmem>>, %arg5: memref<64x32xf32, #tpu.memory_space<vmem>>, %arg6: memref<64x32xf32, #tpu.memory_space<vmem>>, %arg7: memref<32x256xf32, #tpu.memory_space<vmem>>, %arg8: memref<256x128xf32, #tpu.memory_space<vmem>>, %arg9: memref<8x128xf32, #tpu.memory_space<vmem>>, %arg10: memref<8x256xf32, #tpu.memory_space<vmem>>, %arg11: memref<8x256xf32, #tpu.memory_space<vmem>>) attributes {dimension_semantics = [#tpu.dimension_semantics<parallel>], iteration_bounds = array<i64: 1>, scalar_prefetch = 0 : i64, scratch_operands = 0 : i64, tpu.core_type = #tpu.core_type<tc>, window_params = [{transform_indices = @transform_0, window_bounds = array<i64: 8, 64>}, {transform_indices = @transform_1, window_bounds = array<i64: 8, 64>}, {transform_indices = @transform_2, window_bounds = array<i64: 8, 4>}, {pipeline_mode = #tpu.pipeline_mode<synchronous>, transform_indices = @transform_3, window_bounds = array<i64: 1, 256>}, {pipeline_mode = #tpu.pipeline_mode<synchronous>, transform_indices = @transform_4, window_bounds = array<i64: 64, 32>}, {pipeline_mode = #tpu.pipeline_mode<synchronous>, transform_indices = @transform_5, window_bounds = array<i64: 64, 32>}, {pipeline_mode = #tpu.pipeline_mode<synchronous>, transform_indices = @transform_6, window_bounds = array<i64: 32, 256>}, {pipeline_mode = #tpu.pipeline_mode<synchronous>, transform_indices = @transform_7, window_bounds = array<i64: 256, 128>}, {transform_indices = @transform_8, window_bounds = array<i64: 8, 128>}, {transform_indices = @transform_9, window_bounds = array<i64: 8, 256>}, {transform_indices = @transform_10, window_bounds = array<i64: 8, 256>}]} {
    %c0 = arith.constant 0 : index
    %c0_0 = arith.constant 0 : index
    %0 = vector.load %arg3[%c0, %c0_0] : memref<8x4xf32, #tpu.memory_space<vmem>>, vector<8x4xf32>
    %1 = vector.extract_strided_slice %0 {offsets = [0, 0], sizes = [8, 1], strides = [1, 1]} : vector<8x4xf32> to vector<8x1xf32>
    %2 = arith.fptosi %1 : vector<8x1xf32> to vector<8x1xi32>
    %c16_i32 = arith.constant 16 : i32
    %3 = vector.broadcast %c16_i32 : i32 to vector<8x1xi32>
    %4 = arith.muli %2, %3 : vector<8x1xi32>
    %5 = vector.extract_strided_slice %0 {offsets = [0, 1], sizes = [8, 1], strides = [1, 1]} : vector<8x4xf32> to vector<8x1xf32>
    %6 = arith.fptosi %5 : vector<8x1xf32> to vector<8x1xi32>
    %c16_i32_1 = arith.constant 16 : i32
    %7 = vector.broadcast %c16_i32_1 : i32 to vector<8x1xi32>
    %8 = arith.muli %6, %7 : vector<8x1xi32>
    %9 = vector.extract_strided_slice %0 {offsets = [0, 2], sizes = [8, 1], strides = [1, 1]} : vector<8x4xf32> to vector<8x1xf32>
    %10 = vector.extract_strided_slice %0 {offsets = [0, 3], sizes = [8, 1], strides = [1, 1]} : vector<8x4xf32> to vector<8x1xf32>
    %11 = tpu.iota {dimensions = array<i32: 1>} : vector<1x64xi32>
    %12 = vector.broadcast %11 : vector<1x64xi32> to vector<8x64xi32>
    %13 = vector.broadcast %4 : vector<8x1xi32> to vector<8x64xi32>
    %14 = arith.cmpi sge, %12, %13 : vector<8x64xi32>
    %c16_i32_2 = arith.constant 16 : i32
    %15 = vector.broadcast %c16_i32_2 : i32 to vector<8x1xi32>
    %16 = arith.addi %4, %15 : vector<8x1xi32>
    %17 = vector.broadcast %11 : vector<1x64xi32> to vector<8x64xi32>
    %18 = vector.broadcast %16 : vector<8x1xi32> to vector<8x64xi32>
    %19 = arith.cmpi slt, %17, %18 : vector<8x64xi32>
    %20 = arith.andi %14, %19 : vector<8x64xi1>
    %21 = arith.extui %20 : vector<8x64xi1> to vector<8x64xi32>
    %22 = arith.sitofp %21 : vector<8x64xi32> to vector<8x64xf32>
    %23 = vector.broadcast %11 : vector<1x64xi32> to vector<8x64xi32>
    %24 = vector.broadcast %8 : vector<8x1xi32> to vector<8x64xi32>
    %25 = arith.cmpi sge, %23, %24 : vector<8x64xi32>
    %c16_i32_3 = arith.constant 16 : i32
    %26 = vector.broadcast %c16_i32_3 : i32 to vector<8x1xi32>
    %27 = arith.addi %8, %26 : vector<8x1xi32>
    %28 = vector.broadcast %11 : vector<1x64xi32> to vector<8x64xi32>
    %29 = vector.broadcast %27 : vector<8x1xi32> to vector<8x64xi32>
    %30 = arith.cmpi slt, %28, %29 : vector<8x64xi32>
    %31 = arith.andi %25, %30 : vector<8x64xi1>
    %32 = arith.extui %31 : vector<8x64xi1> to vector<8x64xi32>
    %33 = arith.sitofp %32 : vector<8x64xi32> to vector<8x64xf32>
    %c0_4 = arith.constant 0 : index
    %c0_5 = arith.constant 0 : index
    %34 = vector.load %arg1[%c0_4, %c0_5] : memref<8x64xf32, #tpu.memory_space<vmem>>, vector<8x64xf32>
    %35 = arith.mulf %34, %22 : vector<8x64xf32>
    %c0_6 = arith.constant 0 : index
    %c0_7 = arith.constant 0 : index
    %36 = vector.load %arg5[%c0_6, %c0_7] : memref<64x32xf32, #tpu.memory_space<vmem>>, vector<64x32xf32>
    %cst = arith.constant dense<0.000000e+00> : vector<8x32xf32>
    %37 = tpu.matmul %35, %36, %cst {dimension_numbers = #tpu.dot_dimension_numbers<[1], [0], [0], [1], [0, 0, 1, 1], [], []>, precision = #tpu.contract_precision<fp32>} : vector<8x64xf32>, vector<64x32xf32>, vector<8x32xf32> -> vector<8x32xf32>
    %c0_8 = arith.constant 0 : index
    %c0_9 = arith.constant 0 : index
    %38 = vector.load %arg2[%c0_8, %c0_9] : memref<8x64xf32, #tpu.memory_space<vmem>>, vector<8x64xf32>
    %39 = arith.mulf %38, %33 : vector<8x64xf32>
    %c0_10 = arith.constant 0 : index
    %c0_11 = arith.constant 0 : index
    %40 = vector.load %arg6[%c0_10, %c0_11] : memref<64x32xf32, #tpu.memory_space<vmem>>, vector<64x32xf32>
    %cst_12 = arith.constant dense<0.000000e+00> : vector<8x32xf32>
    %41 = tpu.matmul %39, %40, %cst_12 {dimension_numbers = #tpu.dot_dimension_numbers<[1], [0], [0], [1], [0, 0, 1, 1], [], []>, precision = #tpu.contract_precision<fp32>} : vector<8x64xf32>, vector<64x32xf32>, vector<8x32xf32> -> vector<8x32xf32>
    %42 = arith.addf %37, %41 : vector<8x32xf32>
    %43 = tpu.iota {dimensions = array<i32: 1>} : vector<1x32xi32>
    %c16_i32_13 = arith.constant 16 : i32
    %44 = vector.broadcast %c16_i32_13 : i32 to vector<1x32xi32>
    %45 = arith.cmpi sge, %43, %44 : vector<1x32xi32>
    %cst_14 = arith.constant 1.000000e+00 : f32
    %46 = vector.shape_cast %45 : vector<1x32xi1> to vector<1x32xi1>
    %47 = vector.broadcast %46 : vector<1x32xi1> to vector<8x32xi1>
    %48 = vector.shape_cast %10 : vector<8x1xf32> to vector<8x1xf32>
    %49 = vector.broadcast %48 : vector<8x1xf32> to vector<8x32xf32>
    %50 = vector.broadcast %cst_14 : f32 to vector<8x32xf32>
    %51 = arith.select %47, %49, %50 : vector<8x32xi1>, vector<8x32xf32>
    %52 = arith.mulf %42, %51 : vector<8x32xf32>
    %cst_15 = arith.constant 0.000000e+00 : f32
    %53 = vector.shape_cast %45 : vector<1x32xi1> to vector<1x32xi1>
    %54 = vector.broadcast %53 : vector<1x32xi1> to vector<8x32xi1>
    %55 = vector.shape_cast %9 : vector<8x1xf32> to vector<8x1xf32>
    %56 = vector.broadcast %55 : vector<8x1xf32> to vector<8x32xf32>
    %57 = vector.broadcast %cst_15 : f32 to vector<8x32xf32>
    %58 = arith.select %54, %56, %57 : vector<8x32xi1>, vector<8x32xf32>
    %59 = arith.addf %52, %58 : vector<8x32xf32>
    %c0_16 = arith.constant 0 : index
    %c0_17 = arith.constant 0 : index
    %60 = vector.load %arg7[%c0_16, %c0_17] : memref<32x256xf32, #tpu.memory_space<vmem>>, vector<32x256xf32>
    %cst_18 = arith.constant dense<0.000000e+00> : vector<8x256xf32>
    %61 = tpu.matmul %59, %60, %cst_18 {dimension_numbers = #tpu.dot_dimension_numbers<[1], [0], [0], [1], [0, 0, 1, 1], [], []>, precision = #tpu.contract_precision<fp32>} : vector<8x32xf32>, vector<32x256xf32>, vector<8x256xf32> -> vector<8x256xf32>
    %c0_19 = arith.constant 0 : index
    %c0_20 = arith.constant 0 : index
    %62 = vector.load %arg10[%c0_19, %c0_20] : memref<8x256xf32, #tpu.memory_space<vmem>>, vector<8x256xf32>
    tpu.vector_store %arg10[%c0_19, %c0_20], %61 {strides = array<i32>} : memref<8x256xf32, #tpu.memory_space<vmem>>, vector<8x256xf32>,
    %63 = math.absf %61 : vector<8x256xf32>
    %cst_21 = arith.constant 1.000000e+00 : f32
    %64 = vector.broadcast %cst_21 : f32 to vector<8x256xf32>
    %65 = arith.cmpf olt, %63, %64 : vector<8x256xf32>
    %cst_22 = arith.constant 5.000000e-01 : f32
    %66 = vector.broadcast %cst_22 : f32 to vector<8x256xf32>
    %67 = arith.mulf %66, %61 : vector<8x256xf32>
    %68 = arith.mulf %67, %61 : vector<8x256xf32>
    %cst_23 = arith.constant 5.000000e-01 : f32
    %69 = vector.broadcast %cst_23 : f32 to vector<8x256xf32>
    %70 = arith.subf %63, %69 : vector<8x256xf32>
    %71 = arith.select %65, %68, %70 : vector<8x256xi1>, vector<8x256xf32>
    %c0_24 = arith.constant 0 : index
    %c0_25 = arith.constant 0 : index
    %72 = vector.load %arg4[%c0_24, %c0_25] : memref<1x256xf32, #tpu.memory_space<vmem>>, vector<1x256xf32>
    %cst_26 = arith.constant 0.000000e+00 : f32
    %73 = vector.broadcast %cst_26 : f32 to vector<8x256xf32>
    %74 = arith.cmpf olt, %61, %73 : vector<8x256xf32>
    %cst_27 = arith.constant 1.000000e+00 : f32
    %75 = vector.broadcast %cst_27 : f32 to vector<1x256xf32>
    %76 = arith.subf %75, %72 : vector<1x256xf32>
    %77 = vector.shape_cast %76 : vector<1x256xf32> to vector<1x256xf32>
    %78 = vector.broadcast %77 : vector<1x256xf32> to vector<8x256xf32>
    %79 = vector.shape_cast %72 : vector<1x256xf32> to vector<1x256xf32>
    %80 = vector.broadcast %79 : vector<1x256xf32> to vector<8x256xf32>
    %81 = arith.select %74, %78, %80 : vector<8x256xi1>, vector<8x256xf32>
    %82 = arith.mulf %71, %81 : vector<8x256xf32>
    %c0_28 = arith.constant 0 : index
    %c0_29 = arith.constant 0 : index
    %83 = vector.load %arg11[%c0_28, %c0_29] : memref<8x256xf32, #tpu.memory_space<vmem>>, vector<8x256xf32>
    tpu.vector_store %arg11[%c0_28, %c0_29], %82 {strides = array<i32>} : memref<8x256xf32, #tpu.memory_space<vmem>>, vector<8x256xf32>,
    %cst_30 = arith.constant -1.000000e+00 : f32
    %cst_31 = arith.constant 1.000000e+00 : f32
    %84 = vector.broadcast %cst_30 : f32 to vector<8x256xf32>
    %85 = arith.maximumf %84, %61 : vector<8x256xf32>
    %86 = vector.broadcast %cst_31 : f32 to vector<8x256xf32>
    %87 = arith.minimumf %86, %85 : vector<8x256xf32>
    %88 = arith.mulf %81, %87 : vector<8x256xf32>
    %c0_32 = arith.constant 0 : index
    %c0_33 = arith.constant 0 : index
    %89 = vector.load %arg8[%c0_32, %c0_33] : memref<256x128xf32, #tpu.memory_space<vmem>>, vector<256x128xf32>
    %cst_34 = arith.constant dense<0.000000e+00> : vector<8x128xf32>
    %90 = tpu.matmul %88, %89, %cst_34 {dimension_numbers = #tpu.dot_dimension_numbers<[1], [0], [0], [1], [0, 0, 1, 1], [], []>, precision = #tpu.contract_precision<fp32>} : vector<8x256xf32>, vector<256x128xf32>, vector<8x128xf32> -> vector<8x128xf32>
    %cst_35 = arith.constant dense<0.000000e+00> : vector<8xf32>
    %91 = vector.multi_reduction <add>, %82, %cst_35 [1] : vector<8x256xf32> to vector<8xf32>
    %92 = vector.shape_cast %91 : vector<8xf32> to vector<8x1xf32>
    %93 = tpu.iota {dimensions = array<i32: 1>} : vector<1x128xi32>
    %c16_i32_36 = arith.constant 16 : i32
    %94 = vector.broadcast %c16_i32_36 : i32 to vector<1x128xi32>
    %95 = arith.cmpi eq, %93, %94 : vector<1x128xi32>
    %cst_37 = arith.constant 6.250000e-02 : f32
    %cst_38 = arith.constant 0.000000e+00 : f32
    %96 = vector.broadcast %cst_37 : f32 to vector<1x128xf32>
    %97 = vector.broadcast %cst_38 : f32 to vector<1x128xf32>
    %98 = arith.select %95, %96, %97 : vector<1x128xi1>, vector<1x128xf32>
    %cst_39 = arith.constant -6.250000e-02 : f32
    %99 = vector.broadcast %cst_39 : f32 to vector<8x128xf32>
    %100 = arith.mulf %90, %99 : vector<8x128xf32>
    %101 = vector.broadcast %92 : vector<8x1xf32> to vector<8x128xf32>
    %102 = vector.broadcast %98 : vector<1x128xf32> to vector<8x128xf32>
    %103 = arith.mulf %101, %102 : vector<8x128xf32>
    %104 = arith.addf %100, %103 : vector<8x128xf32>
    %c0_40 = arith.constant 0 : index
    %c0_41 = arith.constant 0 : index
    %105 = vector.load %arg9[%c0_40, %c0_41] : memref<8x128xf32, #tpu.memory_space<vmem>>, vector<8x128xf32>
    tpu.vector_store %arg9[%c0_40, %c0_41], %104 {strides = array<i32>} : memref<8x128xf32, #tpu.memory_space<vmem>>, vector<8x128xf32>,
    return
  }
  func.func @transform_0(%arg0: i32) -> (i32, i32) {
    %c0_i32 = arith.constant 0 : i32
    %c0_i32_0 = arith.constant 0 : i32
    return %arg0, %c0_i32 : i32, i32
  }
  func.func @transform_1(%arg0: i32) -> (i32, i32) {
    %c0_i32 = arith.constant 0 : i32
    %c0_i32_0 = arith.constant 0 : i32
    return %arg0, %c0_i32 : i32, i32
  }
  func.func @transform_2(%arg0: i32) -> (i32, i32) {
    %c0_i32 = arith.constant 0 : i32
    %c0_i32_0 = arith.constant 0 : i32
    return %arg0, %c0_i32 : i32, i32
  }
  func.func @transform_3(%arg0: i32) -> (i32, i32) {
    %c0_i32 = arith.constant 0 : i32
    %c0_i32_0 = arith.constant 0 : i32
    %c0_i32_1 = arith.constant 0 : i32
    return %c0_i32, %c0_i32_0 : i32, i32
  }
  func.func @transform_4(%arg0: i32) -> (i32, i32) {
    %c0_i32 = arith.constant 0 : i32
    %c0_i32_0 = arith.constant 0 : i32
    %c0_i32_1 = arith.constant 0 : i32
    return %c0_i32, %c0_i32_0 : i32, i32
  }
  func.func @transform_5(%arg0: i32) -> (i32, i32) {
    %c0_i32 = arith.constant 0 : i32
    %c0_i32_0 = arith.constant 0 : i32
    %c0_i32_1 = arith.constant 0 : i32
    return %c0_i32, %c0_i32_0 : i32, i32
  }
  func.func @transform_6(%arg0: i32) -> (i32, i32) {
    %c0_i32 = arith.constant 0 : i32
    %c0_i32_0 = arith.constant 0 : i32
    %c0_i32_1 = arith.constant 0 : i32
    return %c0_i32, %c0_i32_0 : i32, i32
  }
  func.func @transform_7(%arg0: i32) -> (i32, i32) {
    %c0_i32 = arith.constant 0 : i32
    %c0_i32_0 = arith.constant 0 : i32
    %c0_i32_1 = arith.constant 0 : i32
    return %c0_i32, %c0_i32_0 : i32, i32
  }
  func.func @transform_8(%arg0: i32) -> (i32, i32) {
    %c0_i32 = arith.constant 0 : i32
    %c0_i32_0 = arith.constant 0 : i32
    return %arg0, %c0_i32 : i32, i32
  }
  func.func @transform_9(%arg0: i32) -> (i32, i32) {
    %c0_i32 = arith.constant 0 : i32
    %c0_i32_0 = arith.constant 0 : i32
    return %arg0, %c0_i32 : i32, i32
  }
  func.func @transform_10(%arg0: i32) -> (i32, i32) {
    %c0_i32 = arith.constant 0 : i32
    %c0_i32_0 = arith.constant 0 : i32
    return %arg0, %c0_i32 : i32, i32
  }
}

</mosaic_0001>

<bundles_post_ra>
// kernel: tpu_custom_call.1
= control target key start
LH: loop header
LB: loop body
LE: loop exit
PB: predicated region body
PF: predicated region fallthrough
CT: control target
= control target key end

     0   :  { %16 = vsyncpa [#allocation3], 0  ;;  %s4589_s0 = inlined_call_operand.vmem [shape: f32[8,64], index: 0, kind: input, shape index: {}]   ;;  %s4590_s1 = inlined_call_operand.vmem [shape: f32[8,64], index: 1, kind: input, shape index: {}]   ;;  %s4591_s2 = inlined_call_operand.vmem [shape: f32[8,4], index: 2, kind: input, shape index: {}]   ;;  %s4592_s3 = inlined_call_operand.vmem [shape: f32[1,256], index: 3, kind: input, shape index: {}]   ;;  %s4593_s4 = inlined_call_operand.vmem [shape: f32[64,32], index: 4, kind: input, shape index: {}]   ;;  %s4594_s5 = inlined_call_operand.vmem [shape: f32[64,32], index: 5, kind: input, shape index: {}]   ;;  %s4595_s6 = inlined_call_operand.vmem [shape: f32[32,256], index: 6, kind: input, shape index: {}]   ;;  %s4596_s7 = inlined_call_operand.hbm [shape: f32[256,128], index: 7, kind: input, shape index: {}]   ;;  %s4597_s8 = inlined_call_operand.hbm [shape: f32[8,128], index: 8, kind: output, shape index: {0}]   ;;  %s4598_s9 = inlined_call_operand.hbm [shape: f32[8,256], index: 9, kind: output, shape index: {1}]   ;;  %s4599_s10 = inlined_call_operand.hbm [shape: f32[8,256], index: 10, kind: output, shape index: {2}]  }
   0x1   :  { %17 = vsyncpa [#allocation4], 0 }
   0x2   :  { %18 = vsyncpa [#allocation7], 0  ;;  %s3402_s13 = smov [#allocation2]  }
   0x3   :  { %s38_s14 = sshll.u32 %s3402_s13, 4  ;;  %s39_s14 = int_to_ptr.vmem [resolvable:$true] %s38_s14 }
   0x4   :  { %s3324_s15 = scalar_lea.vmem %s39_s14, 4096  ;;  %p3329_p1 = scmp.lt.s32.totalorder %s39_s14, %s39_s14 }
   0x5   :  { %p3325_p0 = scmp.ne.s32.totalorder %s39_s14, %s3324_s15  ;;  %p3330_p2 = scmp.lt.s32.totalorder %s3324_s15, %s3324_s15 }
   0x7   :  { %p3331_p3 = por %p3330_p2, %p3329_p1 }
   0x9   :  { %p3332_p4 = pnand %p3331_p3, %p3325_p0 }
   0xb   :  { %3335 = shalt.err (!%p3332_p4)
}
   0xc   :  { %s3403_s16 = smov 128   ;;  %s3404_s17 = smov 8  }
   0xd   :  { %44 = dma.hbm_to_vmem [thread:$0]  %s4596_s7, 4096, %s39_s14, [#allocation3], %s3403_s16, %s3403_s16, %s3404_s17  }
   0xe   :  { %3396 = dma.done.wait [#allocation3], 4096  }
   0xf   :  { %3397 = vsyncadd [#allocation3], 4294963200  ;;  %v3405_v0 = vmov 1   ;;  %v3406_v1 = vmov 0   ;;  %v4600_v2 = vmov 0.0   ;;  %v3477_v3 = vld [vmem:[%s4591_s2] sm:$0xff]  ;;  %v4620_v58 = vlaneseq }
  0x10   :  { %3311 = vset.pattern.permute.xlu0 %v3405_v0  ;;  %3312 = vset.pattern.permute.xlu1 %v3406_v1  ;;  %v95_v4 = vld [vmem:[%s4594_s5 + $0x38] sm:$0xff]  ;;  %v94_v5 = vld [vmem:[%s4594_s5 + $0x30] sm:$0xff]  ;;  %v3297_v6 = vtrunc.f32 %v3477_v3  ;;  %v93_v9 = vld [vmem:[%s4594_s5 + $0x28] sm:$0xff]  ;;  %vm3408_vm0 = vmmov 0   ;;  %v3409_v56 = vmov 3   ;;  %v3410_v57 = vmov 2  }
  0x11   :  { %3088 = vmatprep.subr.mxu1 %v4600_v2  ;;  %3069 = vmatprep.subr.mxu0 %v4600_v2  ;;  %v3486_v7 = vand.u32 4294901760, %v95_v4  ;;  %v3488_v8 = vand.u32 4294901760, %v94_v5  ;;  %v92_v10 = vld [vmem:[%s4594_s5 + $0x20] sm:$0xff]  ;;  %v91_v11 = vld [vmem:[%s4594_s5 + $0x18] sm:$0xff]  ;;  %v3499_v12 = vand.u32 4294901760, %v93_v9  ;;  %v90_v15 = vld [vmem:[%s4594_s5 + $0x10] sm:$0xff] }
  0x12   :  { %v3501_v13 = vand.u32 4294901760, %v92_v10  ;;  %v3503_v14 = vand.u32 4294901760, %v91_v11  ;;  %v89_v16 = vld [vmem:[%s4594_s5 + $0x8] sm:$0xff]  ;;  %v3298_v17 = vcvt.f32.s32 %v3297_v6  ;;  %v3528_v23 = vand.u32 4294901760, %v90_v15  ;;  %v88_v31 = vld [vmem:[%s4594_s5] sm:$0xff]  ;;  %3104 = vmatprep.mubr.msk.f32.mxu1 %vm3408_vm0, %v4600_v2  ;;  %3085 = vmatprep.mubr.msk.f32.mxu0 %vm3408_vm0, %v4600_v2 }
  0x13   :  { %v3512_v18 = vsub.f32 %v95_v4, %v3486_v7  ;;  %v3515_v19 = vsub.f32 %v94_v5, %v3488_v8  ;;  %3070 = vmatpush3.msra.mxu0 %v3486_v7  ;;  %v3519_v20 = vsub.f32 %v93_v9, %v3499_v12  ;;  %v3533_v27 = vand.u32 4294901760, %v89_v16  ;;  %v86_v62 = vld [vmem:[%s4590_s1] sm:$0xff] }
  0x14   :  { %v3522_v21 = vsub.f32 %v92_v10, %v3501_v13  ;;  %v3525_v22 = vsub.f32 %v91_v11, %v3503_v14  ;;  %3071 = vmatprep.subr.mxu0 %v4600_v2  ;;  %v50_v24 = vmul.u32 16, %v3298_v17  ;;  %v3538_v30 = vsub.f32 %v90_v15, %v3528_v23  ;;  %v85_v10 = vld [vmem:[%s4593_s4 + $0x38] sm:$0xff]  ;;  %v84_v11 = vld [vmem:[%s4593_s4 + $0x30] sm:$0xff] }
  0x15   :  { %v202_v25 = vand.u32 4294901760, %v3512_v18  ;;  %v209_v26 = vand.u32 4294901760, %v3515_v19  ;;  %3072 = vmatpush3.msra.mxu0 %v3488_v8  ;;  %v216_v28 = vand.u32 4294901760, %v3519_v20  ;;  %v3556_v37 = vsub.f32 %v89_v16, %v3533_v27  ;;  %v83_v16 = vld [vmem:[%s4593_s4 + $0x28] sm:$0xff] }
  0x16   :  { %v223_v29 = vand.u32 4294901760, %v3522_v21  ;;  %3073 = vmatprep.subr.mxu0 %v4600_v2  ;;  %66 = vperm.xlu0 %3311, %v50_v24   ;;  %v57_v32 = vadd.s32 16, %v50_v24  ;;  %v230_v36 = vand.u32 4294901760, %v3525_v22  ;;  %v3559_v39 = vand.u32 4294901760, %v88_v31 }
  0x17   :  { %54 = vperm.xlu1 %3312, %v50_v24   ;;  %v203_v33 = vsub.f32 %v3512_v18, %v202_v25  ;;  %v210_v34 = vsub.f32 %v3515_v19, %v209_v26  ;;  %v217_v35 = vsub.f32 %v3519_v20, %v216_v28  ;;  %3074 = vmatpush3.msra.mxu0 %v3499_v12  ;;  %v237_v42 = vand.u32 4294901760, %v3538_v30 }
  0x18   :  { %3075 = vmatprep.subr.mxu0 %v4600_v2  ;;  %v224_v41 = vsub.f32 %v3522_v21, %v223_v29  ;;  %v3567_v43 = vsub.f32 %v88_v31, %v3559_v39  ;;  %v231_v45 = vsub.f32 %v3525_v22, %v230_v36  ;;  %v244_v46 = vand.u32 4294901760, %v3556_v37  ;;  %v82_v31 = vld [vmem:[%s4593_s4 + $0x20] sm:$0xff] }
  0x19   :  { %v204_v38 = vand.u32 4294901760, %v203_v33  ;;  %v211_v40 = vand.u32 4294901760, %v210_v34  ;;  %3076 = vmatpush3.msra.mxu0 %v3501_v13  ;;  %v218_v44 = vand.u32 4294901760, %v217_v35  ;;  %v238_v48 = vsub.f32 %v3538_v30, %v237_v42 }
  0x1a   :  { %70 = vperm.xlu0 %3311, %v57_v32   ;;  %3077 = vmatprep.subr.mxu0 %v4600_v2  ;;  %v225_v47 = vand.u32 4294901760, %v224_v41  ;;  %v251_v49 = vand.u32 4294901760, %v3567_v43  ;;  %v232_v50 = vand.u32 4294901760, %v231_v45  ;;  %v245_v51 = vsub.f32 %v3556_v37, %v244_v46  ;;  %v79_v45 = vld [vmem:[%s4593_s4 + $0x8] sm:$0xff] }
  0x1b   :  { %59 = vperm.xlu1 %3312, %v57_v32   ;;  %3089 = vmatpush3.msra.mxu1 %v204_v38  ;;  %v239_v52 = vand.u32 4294901760, %v238_v48  ;;  %v3607_v60 = vand.u32 127, %v4620_v58  ;;  %vm96_vm4 = vcmask 523264   ;;  %v3651_v15 = vand.u32 4294901760, %v85_v10 }
  0x1c   :  { %3090 = vmatprep.subr.mxu1 %v4600_v2  ;;  %3078 = vmatpush3.msra.mxu0 %v3503_v14  ;;  %v252_v53 = vsub.f32 %v3567_v43, %v251_v49  ;;  %v246_v54 = vand.u32 4294901760, %v245_v51  ;;  %v3660_v24 = vand.u32 4294901760, %v84_v11  ;;  %v3681_v34 = vand.u32 4294901760, %v82_v31 }
  0x1d   :  { %3091 = vmatpush3.msra.mxu1 %v211_v40  ;;  %3079 = vmatprep.subr.mxu0 %v4600_v2  ;;  %4685 = vst [vmem:[#allocation12_spill] sm:$0xff] %v3607_v60  ;;  %v3670_v32 = vsub.f32 %v85_v10, %v3651_v15  ;;  %v80_v40 = vld [vmem:[%s4593_s4 + $0x10] sm:$0xff]  ;;  %vm1177_vm8 = vcmp.ge.s32.totalorder %v3607_v60, 16  ;;  %vm1201_vm9 = vcmask 261120  }
  0x1e   :  { %3092 = vmatprep.subr.mxu1 %v4600_v2  ;;  %3080 = vmatpush3.msra.mxu0 %v3528_v23  ;;  %v253_v55 = vand.u32 4294901760, %v252_v53  ;;  %v3679_v33 = vsub.f32 %v84_v11, %v3660_v24  ;;  %v1199_v10 = vld [vmem:[%s4595_s6 + $0x30] sm:$0xff] }
  0x1f   :  { %3093 = vmatpush3.msra.mxu1 %v218_v44  ;;  %3081 = vmatprep.subr.mxu0 %v4600_v2  ;;  %v742_v35 = vand.u32 4294901760, %v3670_v32  ;;  %v3706_v44 = vsub.f32 %v82_v31, %v3681_v34  ;;  %v3932_v11 = vand.u32 4294901760, %v1199_v10 }
  0x20   :  { %3094 = vmatprep.subr.mxu1 %v4600_v2  ;;  %3082 = vmatpush3.msra.mxu0 %v3533_v27 }
  0x21   :  { %3095 = vmatpush3.msra.mxu1 %v225_v47  ;;  %3083 = vmatprep.subr.mxu0 %v4600_v2  ;;  %v3715_v47 = vand.u32 4294901760, %v80_v40  ;;  %v3947_v31 = vsub.f32 %v1199_v10, %v3932_v11 }
  0x22   :  { %3096 = vmatprep.subr.mxu1 %v4600_v2  ;;  %3084 = vmatpush3.msra.mxu0 %v3559_v39 }
  0x23   :  { %3097 = vmatpush3.msra.mxu1 %v232_v50  ;;  %3107 = vmatprep.subr.mxu0 %v4600_v2  ;;  %v3732_v50 = vand.u32 4294901760, %v79_v45 }
  0x24   :  { %3098 = vmatprep.subr.mxu1 %v4600_v2  ;;  %3313 = vset.pattern.permute.xlu0 %v3409_v56 }
  0x25   :  { %3099 = vmatpush3.msra.mxu1 %v239_v52  ;;  %3314 = vset.pattern.permute.xlu1 %v3410_v57 }
  0x26   :  { %3100 = vmatprep.subr.mxu1 %v4600_v2  ;;  %1182 = vperm.xlu0 %3313, %v3477_v3  }
  0x27   :  { %3101 = vmatpush3.msra.mxu1 %v246_v54  ;;  %1188 = vperm.xlu1 %3314, %v3477_v3  }
  0x28   :  { %3102 = vmatprep.subr.mxu1 %v4600_v2 }
  0x29   :  { %3103 = vmatpush3.msra.mxu1 %v253_v55 }
  0x2a   :  { %3126 = vmatprep.subr.mxu1 %v4600_v2  ;;  %3315 = vset.pattern.permute.xlu0 %v3410_v57 }
  0x91   :  { %v67_v59 = vpop.permute.xlu0 %66 }
  0x92   :  { %vm68_vm1 = vcmp.ge.s32.totalorder %v3607_v60, %v67_v59  ;;  %v55_v17 = vpop.permute.xlu1 %54 }
  0x93   :  { %vm56_vm5 = vcmp.ge.s32.totalorder %v3607_v60, %v55_v17 }
  0x95   :  { %v71_v61 = vpop.permute.xlu0 %70 }
  0x96   :  { %vm72_vm2 = vcmp.lt.s32.totalorder %v3607_v60, %v71_v61 }
  0x97   :  { %vm73_vm3 = vmand %vm68_vm1, %vm72_vm2 }
  0x98   :  { %v2746_v63 = vsel %vm73_vm3, 1.0, %v4600_v2 }
  0x99   :  { %v87_v0 = vmul.f32 %v2746_v63, %v86_v62 }
  0x9b   :  { %v98_v1 = vsel %vm96_vm4, %v87_v0, 0 }
  0x9c   :  { %v3616_v3 = vand.u32 4294901760, %v98_v1 }
  0x9e   :  { %v174_v4 = vsub.f32 %v98_v1, %v3616_v3  ;;  %3105 = vmatmul.mubr.f32.vlgmr.msra.gmra.mxu1 %v3616_v3 }
  0x9f   :  { %3127 = vmatpush3.msra.mxu1 %v3486_v7  ;;  %3142 = vmatprep.mubr.msk.f32.mxu1 %vm3408_vm0, %v4600_v2 }
  0xa0   :  { %3128 = vmatprep.subr.mxu1 %v4600_v2  ;;  %v175_v5 = vand.u32 4294901760, %v174_v4 }
  0xa1   :  { %3129 = vmatpush3.msra.mxu1 %v3488_v8 }
  0xa2   :  { %3130 = vmatprep.subr.mxu1 %v4600_v2  ;;  %v176_v6 = vsub.f32 %v174_v4, %v175_v5 }
  0xa3   :  { %3131 = vmatpush3.msra.mxu1 %v3499_v12 }
  0xa4   :  { %3132 = vmatprep.subr.mxu1 %v4600_v2  ;;  %v177_v9 = vand.u32 4294901760, %v176_v6  ;;  %v1200_v6 = vld [vmem:[%s4595_s6 + $0x38] sm:$0xff] }
  0xa5   :  { %3133 = vmatpush3.msra.mxu1 %v3501_v13 }
  0xa6   :  { %3134 = vmatprep.subr.mxu1 %v4600_v2  ;;  %3086 = vmatmul.mubr.f32.vlgmr.msra.gmra.mxu0 %v177_v9  ;;  %v3927_v9 = vand.u32 4294901760, %v1200_v6 }
  0xa7   :  { %3108 = vmatpush3.msra.mxu0 %v3512_v18  ;;  %3135 = vmatpush3.msra.mxu1 %v3503_v14  ;;  %v743_v18 = vsub.f32 %v3670_v32, %v742_v35 }
  0xa8   :  { %3109 = vmatprep.subr.mxu0 %v4600_v2  ;;  %3136 = vmatprep.subr.mxu1 %v4600_v2 }
  0xa9   :  { %3110 = vmatpush3.msra.mxu0 %v3515_v19  ;;  %3137 = vmatpush3.msra.mxu1 %v3528_v23 }
  0xaa   :  { %3111 = vmatprep.subr.mxu0 %v4600_v2  ;;  %3138 = vmatprep.subr.mxu1 %v4600_v2 }
  0xab   :  { %3112 = vmatpush3.msra.mxu0 %v3519_v20  ;;  %3139 = vmatpush3.msra.mxu1 %v3533_v27  ;;  %v744_v20 = vand.u32 4294901760, %v743_v18  ;;  %v1193_v18 = vld [vmem:[%s4595_s6] sm:$0xff] }
  0xac   :  { %3113 = vmatprep.subr.mxu0 %v4600_v2  ;;  %3140 = vmatprep.subr.mxu1 %v4600_v2 }
  0xad   :  { %3114 = vmatpush3.msra.mxu0 %v3522_v21  ;;  %3141 = vmatpush3.msra.mxu1 %v3559_v39  ;;  %v3763_v21 = vsub.f32 %v79_v45, %v3732_v50 }
  0xae   :  { %3115 = vmatprep.subr.mxu0 %v4600_v2  ;;  %3143 = vmatmul.mubr.f32.vlgmr.msra.gmra.mxu1 %v175_v5 }
  0xaf   :  { %3164 = vmatprep.subr.mxu1 %v4600_v2  ;;  %3116 = vmatpush3.msra.mxu0 %v3525_v22 }
  0xb0   :  { %3165 = vmatpush3.msra.mxu1 %v3486_v7  ;;  %3117 = vmatprep.subr.mxu0 %v4600_v2  ;;  %v3672_v7 = vand.u32 4294901760, %v83_v16 }
  0xb1   :  { %3166 = vmatprep.subr.mxu1 %v4600_v2  ;;  %3118 = vmatpush3.msra.mxu0 %v3538_v30 }
  0xb2   :  { %3167 = vmatpush3.msra.mxu1 %v3488_v8  ;;  %3119 = vmatprep.subr.mxu0 %v4600_v2  ;;  %v81_v8 = vld [vmem:[%s4593_s4 + $0x18] sm:$0xff]  ;;  %v3693_v38 = vsub.f32 %v83_v16, %v3672_v7  ;;  %v3938_v16 = vsub.f32 %v1200_v6, %v3927_v9 }
  0xb3   :  { %3168 = vmatprep.subr.mxu1 %v4600_v2  ;;  %3120 = vmatpush3.msra.mxu0 %v3556_v37  ;;  %v3699_v41 = vand.u32 4294901760, %v81_v8 }
  0xb4   :  { %3169 = vmatpush3.msra.mxu1 %v3499_v12  ;;  %3121 = vmatprep.subr.mxu0 %v4600_v2  ;;  %v60_v12 = vpop.permute.xlu1 %59 }
  0xb5   :  { %3170 = vmatprep.subr.mxu1 %v4600_v2  ;;  %3122 = vmatpush3.msra.mxu0 %v3567_v43  ;;  %vm61_vm6 = vcmp.lt.s32.totalorder %v3607_v60, %v60_v12  ;;  %v3730_v48 = vsub.f32 %v81_v8, %v3699_v41  ;;  %v1195_v12 = vld [vmem:[%s4595_s6 + $0x10] sm:$0xff] }
  0xb6   :  { %3123 = vmatprep.mubr.msk.f32.mxu0 %vm3408_vm0, %v4600_v2  ;;  %3171 = vmatpush3.msra.mxu1 %v3501_v13  ;;  %v749_v13 = vand.u32 4294901760, %v3679_v33  ;;  %vm62_vm7 = vmand %vm56_vm5, %vm61_vm6  ;;  %v1802_v60 = vld [vmem:[#allocation2 + $0x10] sm:$0xff] }
  0xb7   :  { %3124 = vmatmul.mubr.f32.vlgmr.msra.gmra.mxu0 %v174_v4  ;;  %3145 = vmatprep.subr.mxu0 %v4600_v2  ;;  %v2745_v52 = vsel %vm62_vm7, 1.0, %v4600_v2  ;;  %v770_v53 = vand.u32 4294901760, %v3730_v48 }
  0xb8   :  { %3172 = vmatprep.subr.mxu1 %v4600_v2  ;;  %3146 = vmatpush3.msra.mxu0 %v202_v25  ;;  %v756_v25 = vand.u32 4294901760, %v3693_v38  ;;  %v750_v19 = vsub.f32 %v3679_v33, %v749_v13 }
  0xb9   :  { %3173 = vmatpush3.msra.mxu1 %v3503_v14  ;;  %3147 = vmatprep.subr.mxu0 %v4600_v2  ;;  %v78_v14 = vld [vmem:[%s4593_s4] sm:$0xff]  ;;  %v771_v22 = vsub.f32 %v3730_v48, %v770_v53 }
  0xba   :  { %3174 = vmatprep.subr.mxu1 %v4600_v2  ;;  %3148 = vmatpush3.msra.mxu0 %v209_v26  ;;  %v763_v26 = vand.u32 4294901760, %v3706_v44  ;;  %v3746_v51 = vand.u32 4294901760, %v78_v14 }
  0xbb   :  { %3175 = vmatpush3.msra.mxu1 %v3528_v23  ;;  %3149 = vmatprep.subr.mxu0 %v4600_v2  ;;  %v3744_v23 = vsub.f32 %v80_v40, %v3715_v47  ;;  %v772_v62 = vand.u32 4294901760, %v771_v22  ;;  %v3969_v40 = vand.u32 4294901760, %v1195_v12 }
  0xbc   :  { %3176 = vmatprep.subr.mxu1 %v4600_v2  ;;  %3150 = vmatpush3.msra.mxu0 %v216_v28  ;;  %v757_v28 = vsub.f32 %v3693_v38, %v756_v25  ;;  %v3775_v55 = vsub.f32 %v78_v14, %v3746_v51 }
  0xbd   :  { %3177 = vmatpush3.msra.mxu1 %v3533_v27  ;;  %3151 = vmatprep.subr.mxu0 %v4600_v2  ;;  %v76_v27 = vld [vmem:[%s4589_s0] sm:$0xff]  ;;  %v777_v54 = vand.u32 4294901760, %v3744_v23 }
  0xbe   :  { %3178 = vmatprep.subr.mxu1 %v4600_v2  ;;  %3152 = vmatpush3.msra.mxu0 %v223_v29  ;;  %v751_v29 = vand.u32 4294901760, %v750_v19  ;;  %v77_v56 = vmul.f32 %v2745_v52, %v76_v27  ;;  %v758_v57 = vand.u32 4294901760, %v757_v28 }
  0xbf   :  { %3179 = vmatpush3.msra.mxu1 %v3559_v39  ;;  %3180 = vmatprep.mubr.msk.f32.mxu1 %vm3408_vm0, %v4600_v2  ;;  %v764_v39 = vsub.f32 %v3706_v44, %v763_v26  ;;  %v778_v30 = vsub.f32 %v3744_v23, %v777_v54 }
  0xc0   :  { %3153 = vmatprep.subr.mxu0 %v4600_v2  ;;  %3181 = vmatmul.mubr.f32.vlgmr.msra.gmra.mxu1 %v3616_v3  ;;  %v638_v61 = vsel %vm96_vm4, %v77_v56, 0 }
  0xc1   :  { %3202 = vmatprep.subr.mxu1 %v4600_v2  ;;  %3154 = vmatpush3.msra.mxu0 %v230_v36  ;;  %v784_v36 = vand.u32 4294901760, %v3763_v21  ;;  %v765_v59 = vand.u32 4294901760, %v764_v39  ;;  %v779_v63 = vand.u32 4294901760, %v778_v30 }
  0xc2   :  { %3203 = vmatpush3.msra.mxu1 %v744_v20  ;;  %3155 = vmatprep.subr.mxu0 %v4600_v2 }
  0xc3   :  { %3204 = vmatprep.subr.mxu1 %v4600_v2  ;;  %3156 = vmatpush3.msra.mxu0 %v237_v42  ;;  %v791_v42 = vand.u32 4294901760, %v3775_v55  ;;  %v785_v37 = vsub.f32 %v3763_v21, %v784_v36 }
  0xc4   :  { %3205 = vmatpush3.msra.mxu1 %v751_v29  ;;  %3157 = vmatprep.subr.mxu0 %v4600_v2 }
  0xc5   :  { %3206 = vmatprep.subr.mxu1 %v4600_v2  ;;  %3158 = vmatpush3.msra.mxu0 %v244_v46  ;;  %v3803_v46 = vand.u32 4294901760, %v638_v61  ;;  %v792_v43 = vsub.f32 %v3775_v55, %v791_v42 }
  0xc6   :  { %3207 = vmatpush3.msra.mxu1 %v758_v57  ;;  %3159 = vmatprep.subr.mxu0 %v4600_v2 }
  0xc7   :  { %3208 = vmatprep.subr.mxu1 %v4600_v2  ;;  %3160 = vmatpush3.msra.mxu0 %v251_v49  ;;  %v786_v49 = vand.u32 4294901760, %v785_v37  ;;  %v3816_v0 = vsub.f32 %v638_v61, %v3803_v46  ;;  %v793_v1 = vand.u32 4294901760, %v792_v43 }
  0xc8   :  { %3161 = vmatprep.mubr.msk.f32.mxu0 %vm3408_vm0, %v4600_v2  ;;  %3209 = vmatpush3.msra.mxu1 %v765_v59 }
  0xc9   :  { %3162 = vmatmul.mubr.f32.vlgmr.msra.gmra.mxu0 %v3616_v3  ;;  %3183 = vmatprep.subr.mxu0 %v4600_v2  ;;  %v715_v3 = vand.u32 4294901760, %v3816_v0 }
  0xca   :  { %3210 = vmatprep.subr.mxu1 %v4600_v2  ;;  %3184 = vmatpush3.msra.mxu0 %v3651_v15 }
  0xcb   :  { %3211 = vmatpush3.msra.mxu1 %v772_v62  ;;  %3185 = vmatprep.subr.mxu0 %v4600_v2  ;;  %v716_v4 = vsub.f32 %v3816_v0, %v715_v3 }
  0xcc   :  { %3212 = vmatprep.subr.mxu1 %v4600_v2  ;;  %3186 = vmatpush3.msra.mxu0 %v3660_v24 }
  0xcd   :  { %3213 = vmatpush3.msra.mxu1 %v779_v63  ;;  %3187 = vmatprep.subr.mxu0 %v4600_v2  ;;  %v717_v5 = vand.u32 4294901760, %v716_v4 }
  0xce   :  { %3214 = vmatprep.subr.mxu1 %v4600_v2  ;;  %3188 = vmatpush3.msra.mxu0 %v3672_v7 }
  0xcf   :  { %3215 = vmatpush3.msra.mxu1 %v786_v49  ;;  %3189 = vmatprep.subr.mxu0 %v4600_v2 }
  0xd0   :  { %3216 = vmatprep.subr.mxu1 %v4600_v2  ;;  %3190 = vmatpush3.msra.mxu0 %v3681_v34 }
  0xd1   :  { %3217 = vmatpush3.msra.mxu1 %v793_v1  ;;  %3218 = vmatprep.mubr.msk.f32.mxu1 %vm3408_vm0, %v4600_v2 }
  0xd2   :  { %3191 = vmatprep.subr.mxu0 %v4600_v2  ;;  %3219 = vmatmul.mubr.f32.vlgmr.msra.gmra.mxu1 %v3803_v46 }
  0xd3   :  { %3240 = vmatprep.subr.mxu1 %v4600_v2  ;;  %3192 = vmatpush3.msra.mxu0 %v3699_v41 }
  0xd4   :  { %3241 = vmatpush3.msra.mxu1 %v3651_v15  ;;  %3193 = vmatprep.subr.mxu0 %v4600_v2 }
  0xd5   :  { %3242 = vmatprep.subr.mxu1 %v4600_v2  ;;  %3194 = vmatpush3.msra.mxu0 %v3715_v47 }
  0xd6   :  { %3243 = vmatpush3.msra.mxu1 %v3660_v24  ;;  %3195 = vmatprep.subr.mxu0 %v4600_v2 }
  0xd7   :  { %3244 = vmatprep.subr.mxu1 %v4600_v2  ;;  %3196 = vmatpush3.msra.mxu0 %v3732_v50 }
  0xd8   :  { %3245 = vmatpush3.msra.mxu1 %v3672_v7  ;;  %3197 = vmatprep.subr.mxu0 %v4600_v2 }
  0xd9   :  { %3246 = vmatprep.subr.mxu1 %v4600_v2  ;;  %3198 = vmatpush3.msra.mxu0 %v3746_v51 }
  0xda   :  { %3199 = vmatprep.mubr.msk.f32.mxu0 %vm3408_vm0, %v4600_v2  ;;  %3247 = vmatpush3.msra.mxu1 %v3681_v34 }
  0xdb   :  { %3200 = vmatmul.mubr.f32.vlgmr.msra.gmra.mxu0 %v717_v5  ;;  %3221 = vmatprep.subr.mxu0 %v4600_v2 }
  0xdc   :  { %3248 = vmatprep.subr.mxu1 %v4600_v2  ;;  %3222 = vmatpush3.msra.mxu0 %v3670_v32 }
  0xdd   :  { %3249 = vmatpush3.msra.mxu1 %v3699_v41  ;;  %3223 = vmatprep.subr.mxu0 %v4600_v2 }
  0xde   :  { %3250 = vmatprep.subr.mxu1 %v4600_v2  ;;  %3224 = vmatpush3.msra.mxu0 %v3679_v33  ;;  %v1315_v33 = vand.u32 4294901760, %v3938_v16 }
  0xdf   :  { %3251 = vmatpush3.msra.mxu1 %v3715_v47  ;;  %3225 = vmatprep.subr.mxu0 %v4600_v2 }
  0xe0   :  { %3252 = vmatprep.subr.mxu1 %v4600_v2  ;;  %3226 = vmatpush3.msra.mxu0 %v3693_v38 }
  0xe1   :  { %3253 = vmatpush3.msra.mxu1 %v3732_v50  ;;  %3227 = vmatprep.subr.mxu0 %v4600_v2 }
  0xe2   :  { %3254 = vmatprep.subr.mxu1 %v4600_v2  ;;  %3228 = vmatpush3.msra.mxu0 %v3706_v44 }
  0xe3   :  { %3255 = vmatpush3.msra.mxu1 %v3746_v51  ;;  %3256 = vmatprep.mubr.msk.f32.mxu1 %vm3408_vm0, %v4600_v2 }
  0xe4   :  { %3229 = vmatprep.subr.mxu0 %v4600_v2  ;;  %3257 = vmatmul.mubr.f32.vlgmr.msra.gmra.mxu1 %v715_v3 }
  0xe5   :  { %3278 = vmatprep.subr.mxu1 %v4600_v2  ;;  %3230 = vmatpush3.msra.mxu0 %v3730_v48  ;;  %v3993_v48 = vsub.f32 %v1195_v12, %v3969_v40 }
  0xe6   :  { %3279 = vmatpush3.msra.mxu1 %v3651_v15  ;;  %3231 = vmatprep.subr.mxu0 %v4600_v2  ;;  %v1198_v15 = vld [vmem:[%s4595_s6 + $0x28] sm:$0xff] }
  0xe7   :  { %3280 = vmatprep.subr.mxu1 %v4600_v2  ;;  %3232 = vmatpush3.msra.mxu0 %v3744_v23  ;;  %v3940_v17 = vand.u32 4294901760, %v1198_v15  ;;  %v1345_v27 = vand.u32 4294901760, %v3993_v48 }
  0xe8   :  { %3281 = vmatpush3.msra.mxu1 %v3660_v24  ;;  %3233 = vmatprep.subr.mxu0 %v4600_v2  ;;  %v1197_v24 = vld [vmem:[%s4595_s6 + $0x20] sm:$0xff] }
  0xe9   :  { %3282 = vmatprep.subr.mxu1 %v4600_v2  ;;  %3234 = vmatpush3.msra.mxu0 %v3763_v21  ;;  %v3949_v32 = vand.u32 4294901760, %v1197_v24 }
  0xea   :  { %3283 = vmatpush3.msra.mxu1 %v3672_v7  ;;  %3235 = vmatprep.subr.mxu0 %v4600_v2  ;;  %v1196_v7 = vld [vmem:[%s4595_s6 + $0x18] sm:$0xff] }
  0xeb   :  { %3284 = vmatprep.subr.mxu1 %v4600_v2  ;;  %3236 = vmatpush3.msra.mxu0 %v3775_v55  ;;  %v3959_v8 = vand.u32 4294901760, %v1196_v7  ;;  %v3967_v38 = vsub.f32 %v1197_v24, %v3949_v32 }
  0xec   :  { %3237 = vmatprep.mubr.msk.f32.mxu0 %vm3408_vm0, %v4600_v2  ;;  %3285 = vmatpush3.msra.mxu1 %v3681_v34  ;;  %v3957_v34 = vsub.f32 %v1198_v15, %v3940_v17 }
  0xed   :  { %3238 = vmatmul.mubr.f32.vlgmr.msra.gmra.mxu0 %v3816_v0  ;;  %3259 = vmatprep.subr.mxu0 %v4600_v2  ;;  %v3980_v45 = vsub.f32 %v1196_v7, %v3959_v8  ;;  %v1333_v14 = vand.u32 4294901760, %v3967_v38 }
  0xee   :  { %3286 = vmatprep.subr.mxu1 %v4600_v2  ;;  %3260 = vmatpush3.msra.mxu0 %v742_v35  ;;  %v1321_v35 = vand.u32 4294901760, %v3947_v31  ;;  %v1327_v44 = vand.u32 4294901760, %v3957_v34 }
  0xef   :  { %3287 = vmatpush3.msra.mxu1 %v3699_v41  ;;  %3261 = vmatprep.subr.mxu0 %v4600_v2  ;;  %v1194_v41 = vld [vmem:[%s4595_s6 + $0x8] sm:$0xff]  ;;  %v1339_v23 = vand.u32 4294901760, %v3980_v45  ;;  %v1334_v28 = vsub.f32 %v3967_v38, %v1333_v14 }
  0xf0   :  { %3288 = vmatprep.subr.mxu1 %v4600_v2  ;;  %3262 = vmatpush3.msra.mxu0 %v749_v13  ;;  %v1316_v13 = vsub.f32 %v3938_v16, %v1315_v33 }
  0xf1   :  { %3289 = vmatpush3.msra.mxu1 %v3715_v47  ;;  %3263 = vmatprep.subr.mxu0 %v4600_v2  ;;  %v3982_v47 = vand.u32 4294901760, %v1194_v41  ;;  %v1340_v21 = vsub.f32 %v3980_v45, %v1339_v23  ;;  %v1335_v39 = vand.u32 4294901760, %v1334_v28 }
  0xf2   :  { %3290 = vmatprep.subr.mxu1 %v4600_v2  ;;  %3264 = vmatpush3.msra.mxu0 %v756_v25  ;;  %v1322_v25 = vsub.f32 %v3947_v31, %v1321_v35  ;;  %v1317_v19 = vand.u32 4294901760, %v1316_v13 }
  0xf3   :  { %3291 = vmatpush3.msra.mxu1 %v3732_v50  ;;  %3265 = vmatprep.subr.mxu0 %v4600_v2  ;;  %v3995_v50 = vand.u32 4294901760, %v1193_v18  ;;  %v1341_v56 = vand.u32 4294901760, %v1340_v21 }
  0xf4   :  { %3292 = vmatprep.subr.mxu1 %v4600_v2  ;;  %3266 = vmatpush3.msra.mxu0 %v763_v26  ;;  %v1328_v26 = vsub.f32 %v3957_v34, %v1327_v44  ;;  %v1323_v20 = vand.u32 4294901760, %v1322_v25 }
  0xf5   :  { %3293 = vmatpush3.msra.mxu1 %v3746_v51  ;;  %3294 = vmatprep.mubr.msk.f32.mxu1 %vm3408_vm0, %v4600_v2  ;;  %v4003_v51 = vsub.f32 %v1194_v41, %v3982_v47  ;;  %v4011_v52 = vsub.f32 %v1193_v18, %v3995_v50 }
  0xf6   :  { %3267 = vmatprep.subr.mxu0 %v4600_v2  ;;  %3295 = vmatmul.mubr.f32.vlgmr.msra.gmra.mxu1 %v3803_v46 }
  0xf7   :  { %3268 = vmatpush3.msra.mxu0 %v770_v53  ;;  %3275 = vmatprep.mubr.msk.f32.mxu0 %vm3408_vm0, %v4600_v2  ;;  %v1329_v53 = vand.u32 4294901760, %v1328_v26  ;;  %v1351_v29 = vand.u32 4294901760, %v4003_v51  ;;  %v1357_v55 = vand.u32 4294901760, %v4011_v52 }
  0xf8   :  { %3269 = vmatprep.subr.mxu0 %v4600_v2  ;;  %1393 = vmatprep.mubr.f32.mxu1 %v4600_v2 }
  0xf9   :  { %3270 = vmatpush3.msra.mxu0 %v777_v54  ;;  %1318 = vmatprep.subr.mxu1 %v1317_v19  ;;  %v1346_v54 = vsub.f32 %v3993_v48, %v1345_v27  ;;  %v1352_v57 = vsub.f32 %v4003_v51, %v1351_v29 }
  0xfa   :  { %3271 = vmatprep.subr.mxu0 %v4600_v2  ;;  %1324 = vmatpush1.msra.mxu1 %v1323_v20 }
  0xfb   :  { %3272 = vmatpush3.msra.mxu0 %v784_v36  ;;  %1330 = vmatprep.subr.mxu1 %v1329_v53  ;;  %v1347_v22 = vand.u32 4294901760, %v1346_v54  ;;  %v1358_v36 = vsub.f32 %v4011_v52, %v1357_v55  ;;  %v1353_v59 = vand.u32 4294901760, %v1352_v57 }
  0xfc   :  { %3273 = vmatprep.subr.mxu0 %v4600_v2  ;;  %1336 = vmatpush1.msra.mxu1 %v1335_v39 }
  0xfd   :  { %3274 = vmatpush3.msra.mxu0 %v791_v42  ;;  %1342 = vmatprep.subr.mxu1 %v1341_v56  ;;  %v1359_v30 = vand.u32 4294901760, %v1358_v36  ;;  %v1183_v56 = vpop.permute.xlu0 %1182  ;;  %v1189_v36 = vpop.permute.xlu1 %1188 }
  0xfe   :  { %3276 = vmatmul.mubr.f32.vlgmr.msra.gmra.mxu0 %v3803_v46  ;;  %1230 = vmatprep.subr.mxu0 %v3927_v9 }
  0xff   :  { %1277 = vmatprep.mubr.f32.mxu0 %v4600_v2  ;;  %1232 = vmatpush1.msra.mxu0 %v3932_v11 }
 0x100   :  { %1234 = vmatprep.subr.mxu0 %v3940_v17  ;;  %1348 = vmatpush1.msra.mxu1 %v1347_v22 }
 0x101   :  { %1236 = vmatpush1.msra.mxu0 %v3949_v32  ;;  %1354 = vmatprep.subr.mxu1 %v1353_v59 }
 0x102   :  { %1238 = vmatprep.subr.mxu0 %v3959_v8  ;;  %1360 = vmatpush1.msra.mxu1 %v1359_v30  ;;  %v1185_v30 = vsel %vm1177_vm8, %v1183_v56, 1.0 }
 0x103   :  { %1240 = vmatpush1.msra.mxu0 %v3969_v40  ;;  %1515 = vmatprep.subr.mxu1 %v3927_v9 }
 0x104   :  { %1242 = vmatprep.subr.mxu0 %v3982_v47 }
 0x105   :  { %1244 = vmatpush1.msra.mxu0 %v3995_v50 }
 0x106   :  { %1427 = vmatprep.subr.mxu0 %v3938_v16  ;;  %v1815_v16 = vld [vmem:[#allocation2 + $0x78] sm:$0xff] }
 0x15e   :  { %v290_v42 = vpop.f32.mrf.mxu1 }
 0x160   :  { %v3106_v61 = vpop.f32.mrf.mxu1 }
 0x161   :  { %v1191_v61 = vsel %vm1177_vm8, %v1189_v36, 0.0  ;;  %v1825_v36 = vld [vmem:[#allocation2 + $0xc8] sm:$0xff] }
 0x166   :  { %v179_v62 = vpop.f32.mrf.mxu0 }
 0x167   :  { %v291_v37 = vadd.f32 %v290_v42, %v179_v62 }
 0x168   :  { %v3087_v46 = vpop.f32.mrf.mxu0 }
 0x16e   :  { %v459_v63 = vpop.f32.mrf.mxu1 }
 0x170   :  { %v3144_v43 = vpop.f32.mrf.mxu1 }
 0x177   :  { %v378_v49 = vpop.f32.mrf.mxu0 }
 0x178   :  { %v379_v0 = vadd.f32 %v378_v49, %v291_v37 }
 0x179   :  { %v3125_v1 = vpop.f32.mrf.mxu0 }
 0x17a   :  { %v460_v3 = vadd.f32 %v459_v63, %v379_v0 }
 0x180   :  { %v633_v4 = vpop.f32.mrf.mxu1 }
 0x182   :  { %v3182_v5 = vpop.f32.mrf.mxu1 }
 0x189   :  { %v554_v6 = vpop.f32.mrf.mxu0 }
 0x18a   :  { %v555_v18 = vadd.f32 %v554_v6, %v460_v3 }
 0x18b   :  { %v3163_v10 = vpop.f32.mrf.mxu0 }
 0x18c   :  { %v634_v26 = vadd.f32 %v633_v4, %v555_v18  ;;  %v1827_v10 = vld [vmem:[#allocation2 + $0xd8] sm:$0xff] }
 0x192   :  { %v830_v15 = vpop.f32.mrf.mxu1 }
 0x194   :  { %v3220_v24 = vpop.f32.mrf.mxu1 }
 0x19b   :  { %v719_v7 = vpop.f32.mrf.mxu0 }
 0x19c   :  { %v720_v20 = vadd.f32 %v719_v7, %v634_v26  ;;  %v1826_v26 = vld [vmem:[#allocation2 + $0xd0] sm:$0xff] }
 0x19d   :  { %v3201_v12 = vpop.f32.mrf.mxu0 }
 0x19e   :  { %v831_v53 = vadd.f32 %v830_v15, %v720_v20 }
 0x1a4   :  { %v999_v41 = vpop.f32.mrf.mxu1 }
 0x1a6   :  { %v3258_v13 = vpop.f32.mrf.mxu1 }
 0x1ad   :  { %v918_v25 = vpop.f32.mrf.mxu0 }
 0x1ae   :  { %v919_v39 = vadd.f32 %v918_v25, %v831_v53 }
 0x1af   :  { %v3239_v19 = vpop.f32.mrf.mxu0 }
 0x1b0   :  { %v1000_v54 = vadd.f32 %v999_v41, %v919_v39  ;;  %v1811_v41 = vld [vmem:[#allocation2 + $0x58] sm:$0xff]  ;;  %v1810_v39 = vld [vmem:[#allocation2 + $0x50] sm:$0xff] }
 0x1b6   :  { %v1173_v28 = vpop.f32.mrf.mxu1 }
 0x1b8   :  { %v3296_v21 = vpop.f32.mrf.mxu1 }
 0x1b9   :  { %v4143_v21 = vand.u32 4294901760, %v1827_v10 }
 0x1be   :  { %v1094_v57 = vpop.f32.mrf.mxu0 }
 0x1bf   :  { %v1095_v22 = vadd.f32 %v1094_v57, %v1000_v54 }
 0x1c0   :  { %v3277_v59 = vpop.f32.mrf.mxu0 }
 0x1c1   :  { %v1174_v42 = vadd.f32 %v1173_v28, %v1095_v22  ;;  %v4149_v22 = vand.u32 4294901760, %v1811_v41 }
 0x1c3   :  { %v1186_v62 = vmul.f32 %v1185_v30, %v1174_v42  ;;  %v4155_v42 = vsub.f32 %v1827_v10, %v4143_v21 }
 0x1c5   :  { %v1192_v37 = vadd.f32 %v1191_v61, %v1186_v62  ;;  %v4157_v61 = vand.u32 4294901760, %v1826_v26  ;;  %v1809_v62 = vld [vmem:[#allocation2 + $0x48] sm:$0xff] }
 0x1c7   :  { %v1203_v46 = vsel %vm1201_vm9, %v1192_v37, 0 }
 0x1c8   :  { %v1278_v63 = vand.u32 4294901760, %v1203_v46 }
 0x1ca   :  { %v1279_v43 = vsub.f32 %v1203_v46, %v1278_v63  ;;  %1395 = vmatmul.mubr.f32.vlgmr.msra.gmra.mxu1 %v1278_v63 }
 0x1cb   :  { %1517 = vmatpush1.msra.mxu1 %v3932_v11  ;;  %1562 = vmatprep.mubr.f32.mxu1 %v4600_v2 }
 0x1cc   :  { %1519 = vmatprep.subr.mxu1 %v3940_v17  ;;  %v1280_v49 = vand.u32 4294901760, %v1279_v43 }
 0x1cd   :  { %1521 = vmatpush1.msra.mxu1 %v3949_v32 }
 0x1ce   :  { %1523 = vmatprep.subr.mxu1 %v3959_v8  ;;  %v1281_v0 = vsub.f32 %v1279_v43, %v1280_v49 }
 0x1cf   :  { %1525 = vmatpush1.msra.mxu1 %v3969_v40 }
 0x1d0   :  { %1527 = vmatprep.subr.mxu1 %v3982_v47  ;;  %v1282_v1 = vand.u32 4294901760, %v1281_v0 }
 0x1d1   :  { %1529 = vmatpush1.msra.mxu1 %v3995_v50 }
 0x1d2   :  { %1566 = vmatmul.mubr.f32.vlgmr.msra.gmra.mxu1 %v1280_v49  ;;  %1693 = vmatprep.subr.mxu1 %v3927_v9  ;;  %v1831_v9 = vld [vmem:[#allocation2 + $0xf8] sm:$0xff]  ;;  %v1824_v49 = vld [vmem:[#allocation2 + $0xc0] sm:$0xff] }
 0x1d3   :  { %1283 = vmatmul.mubr.f32.vlgmr.msra.gmra.mxu0 %v1282_v1  ;;  %1695 = vmatpush1.msra.mxu1 %v3932_v11  ;;  %v4073_v11 = vand.u32 4294901760, %v1831_v9  ;;  %v4607_v1 = vand.u32 4294901760, %v4155_v42  ;;  %v4190_v10 = vand.u32 4294901760, %v1824_v49 }
 0x1d4   :  { %1430 = vmatpush1.msra.mxu0 %v3947_v31  ;;  %1697 = vmatprep.subr.mxu1 %v3940_v17  ;;  %v4075_v17 = vand.u32 4294901760, %v1815_v16  ;;  %v1830_v31 = vld [vmem:[#allocation2 + $0xf0] sm:$0xff] }
 0x1d5   :  { %1433 = vmatprep.subr.mxu0 %v3957_v34  ;;  %1699 = vmatpush1.msra.mxu1 %v3949_v32  ;;  %4686 = vst [vmem:[#allocation13_spill] sm:$0xff] %v4073_v11  ;;  %v4078_v32 = vsub.f32 %v1831_v9, %v4073_v11  ;;  %v1814_v34 = vld [vmem:[#allocation2 + $0x70] sm:$0xff]  ;;  %v4171_v9 = vsub.f32 %v1826_v26, %v4157_v61 }
 0x1d6   :  { %1436 = vmatpush1.msra.mxu0 %v3967_v38  ;;  %1701 = vmatprep.subr.mxu1 %v3959_v8  ;;  %v4084_v8 = vsub.f32 %v1815_v16, %v4075_v17  ;;  %v1829_v38 = vld [vmem:[#allocation2 + $0xe8] sm:$0xff]  ;;  %v4173_v16 = vand.u32 4294901760, %v1825_v36 }
 0x1d7   :  { %1439 = vmatprep.subr.mxu0 %v3980_v45  ;;  %1703 = vmatpush1.msra.mxu1 %v3969_v40  ;;  %4687 = vst [vmem:[#allocation14_spill] sm:$0xff] %v4078_v32  ;;  %v4618_v40 = vand.u32 4294901760, %v4078_v32  ;;  %v4093_v45 = vand.u32 4294901760, %v1829_v38 }
 0x1d8   :  { %1442 = vmatpush1.msra.mxu0 %v3993_v48  ;;  %1705 = vmatprep.subr.mxu1 %v3982_v47  ;;  %v1813_v47 = vld [vmem:[#allocation2 + $0x68] sm:$0xff] }
 0x1d9   :  { %1445 = vmatprep.subr.mxu0 %v4003_v51  ;;  %1481 = vmatprep.mubr.f32.mxu0 %v4600_v2  ;;  %v2060_v51 = vsub.f32 %v4078_v32, %v4618_v40  ;;  %v1818_v40 = vld [vmem:[#allocation2 + $0x90] sm:$0xff] }
 0x1da   :  { %1448 = vmatpush1.msra.mxu0 %v4011_v52  ;;  %1707 = vmatpush1.msra.mxu1 %v3995_v50  ;;  %v4100_v50 = vand.u32 4294901760, %v1813_v47  ;;  %v4108_v52 = vsub.f32 %v1829_v38, %v4093_v45 }
 0x1db   :  { %1740 = vmatprep.mubr.f32.mxu1 %v4600_v2  ;;  %1484 = vmatmul.mubr.f32.vlgmr.msra.gmra.mxu0 %v1279_v43  ;;  %v2061_v15 = vand.u32 4294901760, %v2060_v51  ;;  %v4166_v43 = vand.u32 4294901760, %v1810_v39  ;;  %v2088_v51 = vsub.f32 %v4155_v42, %v4607_v1 }
 0x1dc   :  { %1599 = vmatprep.subr.mxu0 %v1315_v33  ;;  %1742 = vmatmul.mubr.f32.vlgmr.msra.gmra.mxu1 %v1278_v63  ;;  %v4080_v33 = vand.u32 4294901760, %v1830_v31  ;;  %v4118_v5 = vsub.f32 %v1813_v47, %v4100_v50  ;;  %v4613_v7 = vand.u32 4294901760, %v4108_v52 }
 0x1dd   :  { %1603 = vmatpush1.msra.mxu0 %v1321_v35  ;;  %1660 = vmatprep.mubr.f32.mxu0 %v4600_v2  ;;  %v4086_v35 = vand.u32 4294901760, %v1814_v34  ;;  %v4178_v47 = vsub.f32 %v1810_v39, %v4166_v43  ;;  %v2089_v26 = vand.u32 4294901760, %v2088_v51  ;;  %v4208_v39 = vsub.f32 %v1824_v49, %v4190_v10 }
 0x1de   :  { %1607 = vmatprep.subr.mxu0 %v1327_v44  ;;  %v4091_v44 = vsub.f32 %v1830_v31, %v4080_v33  ;;  %v4612_v25 = vand.u32 4294901760, %v4118_v5  ;;  %2894 = vmatprep.subr.mxu1 %v2061_v15  ;;  %v2074_v28 = vsub.f32 %v4108_v52, %v4613_v7  ;;  %v1808_v31 = vld [vmem:[#allocation2 + $0x40] sm:$0xff] }
 0x1df   :  { %1611 = vmatpush1.msra.mxu0 %v1333_v14  ;;  %v4617_v14 = vand.u32 4294901760, %v4084_v8  ;;  %v4098_v48 = vsub.f32 %v1814_v34, %v4086_v35  ;;  %v4605_v49 = vand.u32 4294901760, %v4208_v39 }
 0x1e0   :  { %1615 = vmatprep.subr.mxu0 %v1339_v23  ;;  %v1828_v23 = vld [vmem:[#allocation2 + $0xe0] sm:$0xff]  ;;  %v1962_v56 = vsub.f32 %v4118_v5, %v4612_v25  ;;  %v2075_v59 = vand.u32 4294901760, %v2074_v28  ;;  %v1819_v25 = vld [vmem:[#allocation2 + $0x98] sm:$0xff] }
 0x1e1   :  { %1619 = vmatpush1.msra.mxu0 %v1345_v27  ;;  %v4616_v27 = vand.u32 4294901760, %v4091_v44  ;;  %v1948_v3 = vsub.f32 %v4084_v8, %v4617_v14  ;;  %v4614_v4 = vand.u32 4294901760, %v4098_v48  ;;  %v4303_v58 = vand.u32 4294901760, %v1819_v25 }
 0x1e2   :  { %1623 = vmatprep.subr.mxu0 %v1351_v29  ;;  %v4110_v29 = vand.u32 4294901760, %v1828_v23  ;;  %v1963_v37 = vand.u32 4294901760, %v1962_v56 }
 0x1e3   :  { %1627 = vmatpush1.msra.mxu0 %v1357_v55  ;;  %v1812_v55 = vld [vmem:[#allocation2 + $0x60] sm:$0xff]  ;;  %v2067_v24 = vsub.f32 %v4091_v44, %v4616_v27  ;;  %v1949_v13 = vand.u32 4294901760, %v1948_v3  ;;  %v1955_v18 = vsub.f32 %v4098_v48, %v4614_v4  ;;  %v4188_v3 = vsub.f32 %v1825_v36, %v4173_v16  ;;  %4696 = vst [vmem:[#allocation23_spill] sm:$0xff] %v4303_v58 }
 0x1e4   :  { %1662 = vmatmul.mubr.f32.vlgmr.msra.gmra.mxu0 %v1278_v63  ;;  %2859 = vmatprep.subr.mxu0 %v4073_v11  ;;  %v4120_v6 = vand.u32 4294901760, %v1812_v55  ;;  %v4128_v12 = vsub.f32 %v1828_v23, %v4110_v29  ;;  %v4164_v63 = vsub.f32 %v1811_v41, %v4149_v22  ;;  %v4180_v23 = vand.u32 4294901760, %v1809_v62 }
 0x1e5   :  { %2860 = vmatpush3.msra.mxu0 %v4075_v17  ;;  %v2068_v20 = vand.u32 4294901760, %v2067_v24  ;;  %2895 = vmatpush3.msra.mxu1 %v1949_v13  ;;  %v1956_v54 = vand.u32 4294901760, %v1955_v18  ;;  %v4602_v24 = vand.u32 4294901760, %v4178_v47  ;;  %v4200_v13 = vand.u32 4294901760, %v1808_v31  ;;  %v1823_v18 = vld [vmem:[#allocation2 + $0xb8] sm:$0xff] }
 0x1e6   :  { %2861 = vmatprep.subr.mxu0 %v4080_v33  ;;  %v4136_v19 = vsub.f32 %v1812_v55, %v4120_v6  ;;  %v4610_v53 = vand.u32 4294901760, %v4128_v12  ;;  %v4606_v38 = vand.u32 4294901760, %v4164_v63  ;;  %v4604_v55 = vand.u32 4294901760, %v4171_v9 }
 0x1e7   :  { %2862 = vmatpush3.msra.mxu0 %v4086_v35  ;;  %2896 = vmatprep.subr.mxu1 %v2068_v20  ;;  %v4198_v41 = vsub.f32 %v1809_v62, %v4180_v23  ;;  %v4601_v28 = vand.u32 4294901760, %v4188_v3  ;;  %v1983_v36 = vsub.f32 %v4178_v47, %v4602_v24  ;;  %v1822_v62 = vld [vmem:[#allocation2 + $0xb0] sm:$0xff] }
 0x1e8   :  { %2863 = vmatprep.subr.mxu0 %v4093_v45  ;;  %v4609_v57 = vand.u32 4294901760, %v4136_v19  ;;  %v2081_v30 = vsub.f32 %v4128_v12, %v4610_v53  ;;  %2897 = vmatpush3.msra.mxu1 %v1956_v54  ;;  %v1976_v15 = vsub.f32 %v4164_v63, %v4606_v38  ;;  %v2095_v20 = vsub.f32 %v4171_v9, %v4604_v55  ;;  %v1807_v54 = vld [vmem:[#allocation2 + $0x38] sm:$0xff] }
 0x1e9   :  { %2864 = vmatpush3.msra.mxu0 %v4100_v50  ;;  %2898 = vmatprep.subr.mxu1 %v2075_v59  ;;  %v4603_v59 = vand.u32 4294901760, %v4198_v41  ;;  %v1984_v51 = vand.u32 4294901760, %v1983_v36  ;;  %v4229_v2 = vand.u32 4294901760, %v1807_v54  ;;  %v1805_v36 = vld [vmem:[#allocation2 + $0x28] sm:$0xff] }
 0x1ea   :  { %2865 = vmatprep.subr.mxu0 %v4110_v29  ;;  %v1969_v46 = vsub.f32 %v4136_v19, %v4609_v57  ;;  %v2082_v0 = vand.u32 4294901760, %v2081_v30  ;;  %2899 = vmatpush3.msra.mxu1 %v1963_v37  ;;  %v1977_v56 = vand.u32 4294901760, %v1976_v15  ;;  %v4216_v30 = vsub.f32 %v1808_v31, %v4200_v13 }
 0x1eb   :  { %2866 = vmatpush3.msra.mxu0 %v4120_v6  ;;  %v2096_v37 = vand.u32 4294901760, %v2095_v20  ;;  %v1990_v31 = vsub.f32 %v4198_v41, %v4603_v59  ;;  %v4260_v53 = vand.u32 4294901760, %v1805_v36 }
 0x1ec   :  { %2867 = vmatprep.subr.mxu0 %v4143_v21  ;;  %v1970_v34 = vand.u32 4294901760, %v1969_v46  ;;  %2900 = vmatprep.subr.mxu1 %v2082_v0  ;;  %v2102_v46 = vsub.f32 %v4188_v3, %v4601_v28  ;;  %v4223_v0 = vand.u32 4294901760, %v1823_v18  ;;  %v4608_v15 = vand.u32 4294901760, %v4216_v30 }
 0x1ed   :  { %2868 = vmatpush3.msra.mxu0 %v4149_v22  ;;  %v2109_v28 = vsub.f32 %v4208_v39, %v4605_v49  ;;  %v1991_v59 = vand.u32 4294901760, %v1990_v31  ;;  %v1820_v49 = vld [vmem:[#allocation2 + $0xa0] sm:$0xff] }
 0x1ee   :  { %2869 = vmatprep.subr.mxu0 %v4157_v61  ;;  %2901 = vmatpush3.msra.mxu1 %v1970_v34  ;;  %v1806_v34 = vld [vmem:[#allocation2 + $0x30] sm:$0xff]  ;;  %v2103_v20 = vand.u32 4294901760, %v2102_v46  ;;  %v4235_v24 = vsub.f32 %v1823_v18, %v4223_v0  ;;  %v1997_v55 = vsub.f32 %v4216_v30, %v4608_v15  ;;  %v1804_v31 = vld [vmem:[#allocation2 + $0x20] sm:$0xff] }
 0x1ef   :  { %2870 = vmatpush3.msra.mxu0 %v4166_v43  ;;  %2902 = vmatprep.subr.mxu1 %v2089_v26  ;;  %v1821_v26 = vld [vmem:[#allocation2 + $0xa8] sm:$0xff]  ;;  %v4246_v46 = vand.u32 4294901760, %v1806_v34  ;;  %v2110_v18 = vand.u32 4294901760, %v2109_v28 }
 0x1f0   :  { %2871 = vmatprep.subr.mxu0 %v4173_v16  ;;  %2903 = vmatpush3.msra.mxu1 %v1977_v56  ;;  %4688 = vst [vmem:[#allocation15_spill] sm:$0xff] %v4235_v24  ;;  %v4237_v56 = vand.u32 4294901760, %v1822_v62  ;;  %v4611_v38 = vand.u32 4294901760, %v4235_v24 }
 0x1f1   :  { %2872 = vmatpush3.msra.mxu0 %v4180_v23  ;;  %2904 = vmatprep.subr.mxu1 %v2096_v37  ;;  %v4244_v37 = vsub.f32 %v1807_v54, %v4229_v2  ;;  %v1998_v54 = vand.u32 4294901760, %v1997_v55  ;;  %v4258_v57 = vsub.f32 %v1806_v34, %v4246_v46  ;;  %v4270_v55 = vand.u32 4294901760, %v1820_v49 }
 0x1f2   :  { %2873 = vmatprep.subr.mxu0 %v4190_v10  ;;  %2905 = vmatpush3.msra.mxu1 %v1984_v51  ;;  %v4251_v1 = vsub.f32 %v1822_v62, %v4237_v56  ;;  %v4253_v51 = vand.u32 4294901760, %v1821_v26  ;;  %v2116_v28 = vsub.f32 %v4235_v24, %v4611_v38  ;;  %v4280_v38 = vand.u32 4294901760, %v1804_v31 }
 0x1f3   :  { %2874 = vmatpush3.msra.mxu0 %v4200_v13  ;;  %4689 = vst [vmem:[#allocation16_spill] sm:$0xff] %v4244_v37  ;;  %2906 = vmatprep.subr.mxu1 %v2103_v20  ;;  %v4615_v15 = vand.u32 4294901760, %v4244_v37  ;;  %4691 = vst [vmem:[#allocation18_spill] sm:$0xff] %v4258_v57  ;;  %v4622_v34 = vand.u32 4294901760, %v4258_v57  ;;  %v4288_v4 = vsub.f32 %v1820_v49, %v4270_v55 }
 0x1f4   :  { %2875 = vmatprep.subr.mxu0 %v4223_v0  ;;  %4690 = vst [vmem:[#allocation17_spill] sm:$0xff] %v4251_v1  ;;  %2907 = vmatpush3.msra.mxu1 %v1991_v59  ;;  %v4619_v62 = vand.u32 4294901760, %v4251_v1  ;;  %v4268_v20 = vsub.f32 %v1821_v26, %v4253_v51  ;;  %v2117_v26 = vand.u32 4294901760, %v2116_v28  ;;  %v4296_v28 = vsub.f32 %v1804_v31, %v4280_v38 }
 0x1f5   :  { %2876 = vmatpush3.msra.mxu0 %v4229_v2  ;;  %2908 = vmatprep.subr.mxu1 %v2110_v18  ;;  %v2004_v59 = vsub.f32 %v4244_v37, %v4615_v15  ;;  %v4278_v18 = vsub.f32 %v1805_v36, %v4260_v53  ;;  %4694 = vst [vmem:[#allocation21_spill] sm:$0xff] %v4288_v4  ;;  %v1803_v15 = vld [vmem:[#allocation2 + $0x18] sm:$0xff] }
 0x1f6   :  { %2877 = vmatprep.subr.mxu0 %v4237_v56  ;;  %4692 = vst [vmem:[#allocation19_spill] sm:$0xff] %v4268_v20  ;;  %2909 = vmatpush3.msra.mxu1 %v1998_v54  ;;  %v2123_v7 = vsub.f32 %v4251_v1, %v4619_v62  ;;  %v4627_v54 = vand.u32 4294901760, %v4268_v20  ;;  %v2011_v27 = vsub.f32 %v4258_v57, %v4622_v34  ;;  %4695 = vst [vmem:[#allocation22_spill] sm:$0xff] %v4296_v28 }
 0x1f7   :  { %2878 = vmatpush3.msra.mxu0 %v4246_v46  ;;  %4693 = vst [vmem:[#allocation20_spill] sm:$0xff] %v4278_v18  ;;  %v2005_v36 = vand.u32 4294901760, %v2004_v59  ;;  %v4630_v14 = vand.u32 4294901760, %v4278_v18  ;;  %2910 = vmatprep.subr.mxu1 %v2117_v26  ;;  %v4633_v59 = vand.u32 4294901760, %v4288_v4  ;;  %v4638_v57 = vand.u32 4294901760, %v4296_v28 }
 0x1f8   :  { %2879 = vmatprep.subr.mxu0 %v4253_v51  ;;  %v2124_v62 = vand.u32 4294901760, %v2123_v7  ;;  %v2130_v49 = vsub.f32 %v4268_v20, %v4627_v54  ;;  %v2012_v34 = vand.u32 4294901760, %v2011_v27  ;;  %v4309_v1 = vand.u32 4294901760, %v1803_v15  ;;  %v1817_v7 = vld [vmem:[#allocation2 + $0x88] sm:$0xff] }
 0x1f9   :  { %2880 = vmatpush3.msra.mxu0 %v4260_v53  ;;  %2911 = vmatpush3.msra.mxu1 %v2005_v36  ;;  %v2018_v31 = vsub.f32 %v4278_v18, %v4630_v14  ;;  %v2137_v54 = vsub.f32 %v4288_v4, %v4633_v59  ;;  %v4315_v20 = vsub.f32 %v1819_v25, %v4303_v58  ;;  %v4317_v36 = vand.u32 4294901760, %v1818_v40  ;;  %v1801_v27 = vld [vmem:[#allocation2 + $0x8] sm:$0xff]  ;;  %v1816_v59 = vld [vmem:[#allocation2 + $0x80] sm:$0xff] }
 0x1fa   :  { %2881 = vmatprep.subr.mxu0 %v4270_v55  ;;  %4697 = vst [vmem:[#allocation24_spill] sm:$0xff] %v4309_v1  ;;  %2912 = vmatprep.subr.mxu1 %v2124_v62  ;;  %v2131_v26 = vand.u32 4294901760, %v2130_v49  ;;  %v2025_v18 = vsub.f32 %v4296_v28, %v4638_v57  ;;  %v4324_v62 = vsub.f32 %v1803_v15, %v4309_v1  ;;  %v4326_v49 = vand.u32 4294901760, %v1802_v60 }
 0x1fb   :  { %2882 = vmatpush3.msra.mxu0 %v4280_v38  ;;  %4698 = vst [vmem:[#allocation25_spill] sm:$0xff] %v4315_v20  ;;  %4699 = vst [vmem:[#allocation26_spill] sm:$0xff] %v4317_v36  ;;  %2913 = vmatpush3.msra.mxu1 %v2012_v34  ;;  %v2019_v14 = vand.u32 4294901760, %v2018_v31  ;;  %v2138_v25 = vand.u32 4294901760, %v2137_v54  ;;  %v4643_v4 = vand.u32 4294901760, %v4315_v20  ;;  %v4331_v37 = vsub.f32 %v1818_v40, %v4317_v36  ;;  %v1800_v31 = vld [vmem:[#allocation2] sm:$0xff] }
 0x1fc   :  { %2883 = vmatprep.subr.mxu0 %v4303_v58  ;;  %4700 = vst [vmem:[#allocation27_spill] sm:$0xff] %v4324_v62  ;;  %4701 = vst [vmem:[#allocation28_spill] sm:$0xff] %v4326_v49  ;;  %2914 = vmatprep.subr.mxu1 %v2131_v26  ;;  %v4333_v34 = vand.u32 4294901760, %v1817_v7  ;;  %v2026_v15 = vand.u32 4294901760, %v2025_v18  ;;  %v4648_v57 = vand.u32 4294901760, %v4324_v62  ;;  %v4338_v28 = vsub.f32 %v1802_v60, %v4326_v49 }
 0x1fd   :  { %2884 = vmatpush3.msra.mxu0 %v4309_v1  ;;  %4702 = vst [vmem:[#allocation29_spill] sm:$0xff] %v4331_v37  ;;  %2915 = vmatpush3.msra.mxu1 %v2019_v14  ;;  %v4340_v1 = vand.u32 4294901760, %v1801_v27  ;;  %v2144_v40 = vsub.f32 %v4315_v20, %v4643_v4  ;;  %v4651_v54 = vand.u32 4294901760, %v4331_v37  ;;  %v4350_v14 = vand.u32 4294901760, %v1816_v59 }
 0x1fe   :  { %4703 = vst [vmem:[#allocation30_spill] sm:$0xff] %v4333_v34  ;;  %2885 = vmatprep.subr.mxu0 %v4317_v36  ;;  %4704 = vst [vmem:[#allocation31_spill] sm:$0xff] %v4338_v28  ;;  %2916 = vmatprep.subr.mxu1 %v2138_v25  ;;  %v4348_v26 = vsub.f32 %v1817_v7, %v4333_v34  ;;  %v2032_v60 = vsub.f32 %v4324_v62, %v4648_v57  ;;  %v4654_v18 = vand.u32 4294901760, %v4338_v28 }
 0x1ff   :  { %4705 = vst [vmem:[#allocation32_spill] sm:$0xff] %v4340_v1  ;;  %2886 = vmatpush3.msra.mxu0 %v4326_v49  ;;  %4707 = vst [vmem:[#allocation34_spill] sm:$0xff] %v4350_v14  ;;  %2917 = vmatpush3.msra.mxu1 %v2026_v15  ;;  %v4358_v25 = vsub.f32 %v1801_v27, %v4340_v1  ;;  %v4360_v4 = vand.u32 4294901760, %v1800_v31  ;;  %v2145_v7 = vand.u32 4294901760, %v2144_v40 }
 0x200   :  { %4706 = vst [vmem:[#allocation33_spill] sm:$0xff] %v4348_v26  ;;  %2887 = vmatprep.subr.mxu0 %v4333_v34  ;;  %v2151_v20 = vsub.f32 %v4331_v37, %v4651_v54  ;;  %v4657_v15 = vand.u32 4294901760, %v4348_v26  ;;  %v4368_v34 = vsub.f32 %v1816_v59, %v4350_v14  ;;  %v2033_v57 = vand.u32 4294901760, %v2032_v60 }
 0x201   :  { %4708 = vst [vmem:[#allocation35_spill] sm:$0xff] %v4358_v25  ;;  %4709 = vst [vmem:[#allocation36_spill] sm:$0xff] %v4360_v4  ;;  %2888 = vmatpush3.msra.mxu0 %v4340_v1  ;;  %v2039_v27 = vsub.f32 %v4338_v28, %v4654_v18  ;;  %v4658_v62 = vand.u32 4294901760, %v4358_v25  ;;  %v4376_v40 = vsub.f32 %v1800_v31, %v4360_v4  ;;  %2918 = vmatprep.subr.mxu1 %v2145_v7 }
 0x202   :  { %4710 = vst [vmem:[#allocation37_spill] sm:$0xff] %v4368_v34  ;;  %2889 = vmatprep.subr.mxu0 %v4350_v14  ;;  %v2152_v54 = vand.u32 4294901760, %v2151_v20  ;;  %v2158_v59 = vsub.f32 %v4348_v26, %v4657_v15  ;;  %v4662_v37 = vand.u32 4294901760, %v4368_v34  ;;  %2919 = vmatpush3.msra.mxu1 %v2033_v57 }
 0x203   :  { %4711 = vst [vmem:[#allocation38_spill] sm:$0xff] %v4376_v40  ;;  %2890 = vmatpush3.msra.mxu0 %v4360_v4  ;;  %v2040_v60 = vand.u32 4294901760, %v2039_v27  ;;  %v2046_v18 = vsub.f32 %v4358_v25, %v4658_v62  ;;  %v4669_v31 = vand.u32 4294901760, %v4376_v40 }
 0x204   :  { %2929 = vmatprep.subr.mxu0 %v4078_v32  ;;  %2920 = vmatprep.subr.mxu1 %v2152_v54  ;;  %v2159_v28 = vand.u32 4294901760, %v2158_v59  ;;  %v2165_v20 = vsub.f32 %v4368_v34, %v4662_v37  ;;  %v4712_v34 = vlaneseq }
 0x205   :  { %2921 = vmatpush3.msra.mxu1 %v2040_v60  ;;  %v2047_v7 = vand.u32 4294901760, %v2046_v18  ;;  %v2053_v15 = vsub.f32 %v4376_v40, %v4669_v31 }
 0x206   :  { %2922 = vmatprep.subr.mxu1 %v2159_v28  ;;  %v2166_v57 = vand.u32 4294901760, %v2165_v20  ;;  %v1768_v26 = vshrl.u32 %v4712_v34, 7  ;;  %v1762_v28 = vld [vmem:[%s4592_s3] sm:$0x3]  ;;  %s3411_s3 = smov [#allocation6]  }
 0x207   :  { %2923 = vmatpush3.msra.mxu1 %v2047_v7  ;;  %v2054_v27 = vand.u32 4294901760, %v2053_v15  ;;  %v1765_v7 = vsub.f32 1.0, %v1762_v28  ;;  %s2719_s24 = sshll.u32 %s3411_s3, 4  ;;  %s2720_s24 = int_to_ptr.vmem [resolvable:$true] %s2719_s24 }
 0x208   :  { %2924 = vmatprep.subr.mxu1 %v2166_v57  ;;  %v1769_v57 = vsub.s32 0, %v1768_v26  ;;  %v1773_v14 = vsub.s32 1, %v1768_v26  ;;  %s3336_s25 = scalar_lea.vmem %s2720_s24, 256  ;;  %p3341_p6 = scmp.lt.s32.totalorder %s2720_s24, %s2720_s24 }
 0x209   :  { %2925 = vmatpush3.msra.mxu1 %v2054_v27  ;;  %p3337_p5 = scmp.ne.s32.totalorder %s2720_s24, %s3336_s25  ;;  %p3342_p7 = scmp.lt.s32.totalorder %s3336_s25, %s3336_s25 }
 0x20a   :  { %2964 = vmatprep.subr.mxu1 %v4073_v11  ;;  %v1770_v49 = vrot.slane %v1765_v7, %v1769_v57  ;;  %v1781_v36 = vrot.slane %v1762_v28, %v1769_v57 }
 0x20b   :  { %p3343_p8 = por %p3342_p7, %p3341_p6 }
 0x20d   :  { %p3344_p9 = pnand %p3343_p8, %p3337_p5 }
 0x28a   :  { %v1396_v59 = vpop.f32.mrf.mxu1 }
 0x28c   :  { %v1398_v25 = vpop.f32.mrf.mxu1 }
 0x292   :  { %v1567_v60 = vpop.f32.mrf.mxu1 }
 0x293   :  { %v1284_v54 = vpop.f32.mrf.mxu0 }
 0x294   :  { %v1397_v37 = vadd.f32 %v1396_v59, %v1284_v54  ;;  %v1569_v20 = vpop.f32.mrf.mxu1 }
 0x295   :  { %v1286_v62 = vpop.f32.mrf.mxu0 }
 0x296   :  { %v1399_v4 = vadd.f32 %v1398_v25, %v1286_v62  ;;  %v1785_v25 = vrot.slane %v1762_v28, %v1773_v14 }
 0x29b   :  { %v1485_v32 = vpop.f32.mrf.mxu0 }
 0x29c   :  { %v1486_v31 = vadd.f32 %v1485_v32, %v1397_v37  ;;  %v1743_v40 = vpop.f32.mrf.mxu1  ;;  %v1774_v37 = vrot.slane %v1765_v7, %v1773_v14 }
 0x29d   :  { %v1487_v18 = vpop.f32.mrf.mxu0 }
 0x29e   :  { %v1488_v15 = vadd.f32 %v1487_v18, %v1399_v4  ;;  %v1568_v27 = vadd.f32 %v1567_v60, %v1486_v31  ;;  %v1745_v32 = vpop.f32.mrf.mxu1 }
 0x2a0   :  { %v1570_v54 = vadd.f32 %v1569_v20, %v1488_v15 }
 0x2a4   :  { %v1663_v11 = vpop.f32.mrf.mxu0 }
 0x2a5   :  { %v1664_v1 = vadd.f32 %v1663_v11, %v1568_v27 }
 0x2a6   :  { %v1665_v59 = vpop.f32.mrf.mxu0 }
 0x2a7   :  { %v1744_v34 = vadd.f32 %v1743_v40, %v1664_v1  ;;  %v1666_v62 = vadd.f32 %v1665_v59, %v1570_v54 }
 0x2a9   :  { %1748 = vst [vmem:[#allocation6] sm:$0xff] %v1744_v34  ;;  %v1746_v58 = vadd.f32 %v1745_v32, %v1666_v62  ;;  %vm1763_vm10 = vcmp.lt.f32.partialorder %v1744_v34, 0.0  ;;  %v2749_v4 = vclamps-f32 %v1744_v34, 1.0  ;;  %v1750_v18 = vand.u32 2147483647, %v1744_v34 }
 0x2aa   :  { %v1788_v24 = vsel %vm1763_vm10, %v1770_v49, %v1781_v36  ;;  %v1754_v31 = vmul.f32 0.5, %v1744_v34 }
 0x2ab   :  { %1749 = vst [vmem:[#allocation6 + $0x8] sm:$0xff] %v1746_v58  ;;  %vm1764_vm11 = vcmp.lt.f32.partialorder %v1746_v58, 0.0  ;;  %v2750_v26 = vclamps-f32 %v1746_v58, 1.0  ;;  %v1798_v11 = vmul.f32 %v2749_v4, %v1788_v24  ;;  %v1751_v60 = vand.u32 2147483647, %v1746_v58 }
 0x2ac   :  { %v1789_v15 = vsel %vm1764_vm11, %v1774_v37, %v1785_v25  ;;  %vm1752_vm12 = vcmp.lt.f32.partialorder %v1750_v18, 1.0  ;;  %v1755_v20 = vmul.f32 0.5, %v1746_v58  ;;  %v1756_v1 = vmul.f32 %v1754_v31, %v1744_v34  ;;  %v4713_v31 = vld [vmem:[#allocation15_spill] sm:$0xff] }
 0x2ad   :  { %v1799_v40 = vmul.f32 %v2750_v26, %v1789_v15  ;;  %v4399_v57 = vand.u32 4294901760, %v1798_v11  ;;  %vm1753_vm13 = vcmp.lt.f32.partialorder %v1751_v60, 1.0  ;;  %v2747_v14 = vadd.f32 -0.5, %v1750_v18  ;;  %v4714_v26 = vld [vmem:[#allocation23_spill] sm:$0xff] }
 0x2ae   :  { %v1757_v28 = vmul.f32 %v1755_v20, %v1746_v58  ;;  %v2748_v7 = vadd.f32 -0.5, %v1751_v60  ;;  %v4716_v60 = vld [vmem:[#allocation24_spill] sm:$0xff]  ;;  %v4718_v20 = vld [vmem:[#allocation26_spill] sm:$0xff] }
 0x2af   :  { %v4401_v27 = vand.u32 4294901760, %v1799_v40  ;;  %v4404_v36 = vsub.f32 %v1798_v11, %v4399_v57  ;;  %v1760_v49 = vsel %vm1752_vm12, %v1756_v1, %v2747_v14  ;;  %v4715_v11 = vld [vmem:[#allocation16_spill] sm:$0xff]  ;;  %v4719_v1 = vld [vmem:[#allocation18_spill] sm:$0xff]  ;;  %v4721_v14 = vld [vmem:[#allocation19_spill] sm:$0xff] }
 0x2b0   :  { %v1761_v54 = vsel %vm1753_vm13, %v1757_v28, %v2748_v7  ;;  %v1790_v59 = vmul.f32 %v1788_v24, %v1760_v49  ;;  %v4722_v28 = vld [vmem:[#allocation30_spill] sm:$0xff]  ;;  %v4723_v7 = vld [vmem:[#allocation20_spill] sm:$0xff] }
 0x2b1   :  { %2169 = vmatprep.mubr.f32.mxu1 %v4401_v27  ;;  %v1791_v62 = vmul.f32 %v1789_v15, %v1761_v54  ;;  %v1929_v34 = vsub.f32 %v1799_v40, %v4401_v27  ;;  %v1936_v32 = vand.u32 4294901760, %v4404_v36  ;;  %v4717_v15 = vld [vmem:[#allocation17_spill] sm:$0xff]  ;;  %v4720_v40 = vld [vmem:[#allocation28_spill] sm:$0xff] }
 0x2b2   :  { %2171 = vmatmul.mubr.f32.vlgmr.msra.gmra.mxu1 %v4399_v57  ;;  %1792 = vst [vmem:[#allocation8] sm:$0xff] %v1790_v59  ;;  %v4724_v49 = vld [vmem:[#allocation32_spill] sm:$0xff]  ;;  %v4725_v54 = vld [vmem:[#allocation21_spill] sm:$0xff] }
 0x2b3   :  { %2965 = vmatpush3.msra.mxu1 %v4075_v17  ;;  %v2694_v58 = vadd.f32 %v1791_v62, %v1790_v59  ;;  %1793 = vst [vmem:[#allocation8 + $0x8] sm:$0xff] %v1791_v62  ;;  %v1930_v37 = vand.u32 4294901760, %v1929_v34  ;;  %v1937_v24 = vsub.f32 %v4404_v36, %v1936_v32  ;;  %v4726_v59 = vld [vmem:[#allocation34_spill] sm:$0xff] }
 0x2b4   :  { %2966 = vmatprep.subr.mxu1 %v4080_v33  ;;  %v4727_v62 = vld [vmem:[#allocation22_spill] sm:$0xff] }
 0x2b5   :  { %2967 = vmatpush3.msra.mxu1 %v4086_v35  ;;  %2695 = vadd.xlane.f32.xlu1 %v2694_v58  ;;  %v1931_v25 = vsub.f32 %v1929_v34, %v1930_v37  ;;  %v1938_v18 = vand.u32 4294901760, %v1937_v24  ;;  %v4729_v58 = vld [vmem:[#allocation25_spill] sm:$0xff]  ;;  %v4731_v24 = vld [vmem:[#allocation27_spill] sm:$0xff] }
 0x2b6   :  { %2968 = vmatprep.subr.mxu1 %v4093_v45  ;;  %2413 = vmatprep.mubr.f32.mxu1 %v1930_v37  ;;  %v4730_v37 = vld [vmem:[#allocation13_spill] sm:$0xff] }
 0x2b7   :  { %2969 = vmatpush3.msra.mxu1 %v4100_v50  ;;  %v1932_v4 = vand.u32 4294901760, %v1931_v25  ;;  %v4732_v25 = vld [vmem:[#allocation29_spill] sm:$0xff] }
 0x2b8   :  { %2970 = vmatprep.subr.mxu1 %v4110_v29 }
 0x2b9   :  { %2971 = vmatpush3.msra.mxu1 %v4120_v6  ;;  %1933 = vmatprep.mubr.f32.mxu0 %v1932_v4  ;;  %v4733_v4 = vld [vmem:[#allocation31_spill] sm:$0xff] }
 0x2ba   :  { %2972 = vmatprep.subr.mxu1 %v4143_v21  ;;  %1939 = vmatmul.mubr.f32.vlgmr.msra.gmra.mxu0 %v1938_v18  ;;  %v4734_v18 = vld [vmem:[#allocation33_spill] sm:$0xff] }
 0x2bb   :  { %2930 = vmatpush3.msra.mxu0 %v4084_v8  ;;  %2973 = vmatpush3.msra.mxu1 %v4149_v22 }
 0x2bc   :  { %2931 = vmatprep.subr.mxu0 %v4091_v44  ;;  %2306 = vmatprep.mubr.f32.mxu0 %v1929_v34  ;;  %v4728_v34 = vld [vmem:[#allocation36_spill] sm:$0xff] }
 0x2bd   :  { %2974 = vmatprep.subr.mxu1 %v4157_v61  ;;  %2932 = vmatpush3.msra.mxu0 %v4098_v48 }
 0x2be   :  { %2975 = vmatpush3.msra.mxu1 %v4166_v43  ;;  %2933 = vmatprep.subr.mxu0 %v4108_v52 }
 0x2bf   :  { %2976 = vmatprep.subr.mxu1 %v4173_v16  ;;  %2934 = vmatpush3.msra.mxu0 %v4118_v5 }
 0x2c0   :  { %2977 = vmatpush3.msra.mxu1 %v4180_v23  ;;  %2935 = vmatprep.subr.mxu0 %v4128_v12 }
 0x2c1   :  { %2978 = vmatprep.subr.mxu1 %v4190_v10  ;;  %2936 = vmatpush3.msra.mxu0 %v4136_v19 }
 0x2c2   :  { %2979 = vmatpush3.msra.mxu1 %v4200_v13  ;;  %2937 = vmatprep.subr.mxu0 %v4155_v42 }
 0x2c3   :  { %2980 = vmatprep.subr.mxu1 %v4223_v0  ;;  %2938 = vmatpush3.msra.mxu0 %v4164_v63 }
 0x2c4   :  { %2981 = vmatpush3.msra.mxu1 %v4229_v2  ;;  %2939 = vmatprep.subr.mxu0 %v4171_v9 }
 0x2c5   :  { %2982 = vmatprep.subr.mxu1 %v4237_v56  ;;  %2940 = vmatpush3.msra.mxu0 %v4178_v47 }
 0x2c6   :  { %2983 = vmatpush3.msra.mxu1 %v4246_v46  ;;  %2941 = vmatprep.subr.mxu0 %v4188_v3 }
 0x2c7   :  { %2984 = vmatprep.subr.mxu1 %v4253_v51  ;;  %2942 = vmatpush3.msra.mxu0 %v4198_v41 }
 0x2c8   :  { %2985 = vmatpush3.msra.mxu1 %v4260_v53  ;;  %2943 = vmatprep.subr.mxu0 %v4208_v39 }
 0x2c9   :  { %2986 = vmatprep.subr.mxu1 %v4270_v55  ;;  %2944 = vmatpush3.msra.mxu0 %v4216_v30 }
 0x2ca   :  { %2987 = vmatpush3.msra.mxu1 %v4280_v38  ;;  %2945 = vmatprep.subr.mxu0 %v4713_v31 }
 0x2cb   :  { %2988 = vmatprep.subr.mxu1 %v4714_v26  ;;  %2946 = vmatpush3.msra.mxu0 %v4715_v11 }
 0x2cc   :  { %2989 = vmatpush3.msra.mxu1 %v4716_v60  ;;  %2947 = vmatprep.subr.mxu0 %v4717_v15 }
 0x2cd   :  { %2990 = vmatprep.subr.mxu1 %v4718_v20  ;;  %2948 = vmatpush3.msra.mxu0 %v4719_v1 }
 0x2ce   :  { %2991 = vmatpush3.msra.mxu1 %v4720_v40  ;;  %2949 = vmatprep.subr.mxu0 %v4721_v14 }
 0x2cf   :  { %2992 = vmatprep.subr.mxu1 %v4722_v28  ;;  %2950 = vmatpush3.msra.mxu0 %v4723_v7 }
 0x2d0   :  { %2993 = vmatpush3.msra.mxu1 %v4724_v49  ;;  %2951 = vmatprep.subr.mxu0 %v4725_v54 }
 0x2d1   :  { %2994 = vmatprep.subr.mxu1 %v4726_v59  ;;  %2952 = vmatpush3.msra.mxu0 %v4727_v62 }
 0x2d2   :  { %2995 = vmatpush3.msra.mxu1 %v4728_v34  ;;  %2953 = vmatprep.subr.mxu0 %v4729_v58 }
 0x2d3   :  { %2417 = vmatmul.mubr.f32.vlgmr.msra.gmra.mxu1 %v1936_v32  ;;  %3034 = vmatprep.subr.mxu1 %v4730_v37  ;;  %v4735_v32 = vld [vmem:[#allocation35_spill] sm:$0xff]  ;;  %v4736_v37 = vld [vmem:[#allocation37_spill] sm:$0xff] }
 0x2d4   :  { %2954 = vmatpush3.msra.mxu0 %v4731_v24  ;;  %3035 = vmatpush3.msra.mxu1 %v4075_v17  ;;  %v4737_v17 = vld [vmem:[#allocation38_spill] sm:$0xff] }
 0x2d5   :  { %2687 = vmatprep.mubr.f32.mxu1 %v4401_v27  ;;  %2955 = vmatprep.subr.mxu0 %v4732_v25 }
 0x2d6   :  { %3036 = vmatprep.subr.mxu1 %v4080_v33  ;;  %2956 = vmatpush3.msra.mxu0 %v4733_v4  ;;  %v4738_v33 = vld [vmem:[#allocation14_spill] sm:$0xff] }
 0x2d7   :  { %3037 = vmatpush3.msra.mxu1 %v4086_v35  ;;  %2957 = vmatprep.subr.mxu0 %v4734_v18  ;;  %v4739_v35 = vand.u32 4294901760, %v4738_v33 }
 0x2d8   :  { %3038 = vmatprep.subr.mxu1 %v4093_v45  ;;  %2958 = vmatpush3.msra.mxu0 %v4735_v32  ;;  %v4740_v45 = vand.u32 4294901760, %v4084_v8  ;;  %v4744_v8 = vand.u32 4294901760, %v4118_v5  ;;  %v4748_v5 = vand.u32 4294901760, %v4164_v63  ;;  %v4756_v63 = vand.u32 4294901760, %v4715_v11 }
 0x2d9   :  { %3039 = vmatpush3.msra.mxu1 %v4100_v50  ;;  %2959 = vmatprep.subr.mxu0 %v4736_v37  ;;  %v4741_v50 = vand.u32 4294901760, %v4091_v44  ;;  %v4745_v44 = vand.u32 4294901760, %v4128_v12  ;;  %v4749_v12 = vand.u32 4294901760, %v4171_v9  ;;  %v4759_v9 = vand.u32 4294901760, %v4721_v14 }
 0x2da   :  { %3040 = vmatprep.subr.mxu1 %v4110_v29  ;;  %2960 = vmatpush3.msra.mxu0 %v4737_v17  ;;  %v4742_v29 = vand.u32 4294901760, %v4098_v48  ;;  %v4746_v48 = vand.u32 4294901760, %v4136_v19  ;;  %v4750_v19 = vand.u32 4294901760, %v4178_v47  ;;  %v4762_v47 = vand.u32 4294901760, %v4727_v62 }
 0x2db   :  { %3041 = vmatpush3.msra.mxu1 %v4120_v6  ;;  %2309 = vmatmul.mubr.f32.vlgmr.msra.gmra.mxu0 %v4404_v36  ;;  %v4743_v6 = vand.u32 4294901760, %v4108_v52  ;;  %v4747_v52 = vand.u32 4294901760, %v4155_v42  ;;  %v4754_v42 = vand.u32 4294901760, %v4216_v30  ;;  %v4769_v30 = vand.u32 4294901760, %v4736_v37 }
 0x2dc   :  { %2999 = vmatprep.subr.mxu0 %v4739_v35  ;;  %3042 = vmatprep.subr.mxu1 %v4143_v21  ;;  %v4751_v21 = vand.u32 4294901760, %v4188_v3  ;;  %v4764_v3 = vand.u32 4294901760, %v4731_v24 }
 0x2dd   :  { %3000 = vmatpush3.msra.mxu0 %v4740_v45  ;;  %2583 = vmatprep.mubr.f32.mxu0 %v4401_v27 }
 0x2de   :  { %3043 = vmatpush3.msra.mxu1 %v4149_v22  ;;  %3001 = vmatprep.subr.mxu0 %v4741_v50  ;;  %v4752_v22 = vand.u32 4294901760, %v4198_v41  ;;  %v4766_v41 = vand.u32 4294901760, %v4733_v4 }
 0x2df   :  { %3044 = vmatprep.subr.mxu1 %v4157_v61  ;;  %3002 = vmatpush3.msra.mxu0 %v4742_v29  ;;  %v4755_v61 = vand.u32 4294901760, %v4713_v31 }
 0x2e0   :  { %3045 = vmatpush3.msra.mxu1 %v4166_v43  ;;  %3003 = vmatprep.subr.mxu0 %v4743_v6  ;;  %v4758_v43 = vand.u32 4294901760, %v4719_v1 }
 0x2e1   :  { %3046 = vmatprep.subr.mxu1 %v4173_v16  ;;  %3004 = vmatpush3.msra.mxu0 %v4744_v8  ;;  %v4760_v16 = vand.u32 4294901760, %v4723_v7 }
 0x2e2   :  { %3047 = vmatpush3.msra.mxu1 %v4180_v23  ;;  %3005 = vmatprep.subr.mxu0 %v4745_v44  ;;  %v4763_v23 = vand.u32 4294901760, %v4729_v58 }
 0x2e3   :  { %3048 = vmatprep.subr.mxu1 %v4190_v10  ;;  %3006 = vmatpush3.msra.mxu0 %v4746_v48  ;;  %v4765_v10 = vand.u32 4294901760, %v4732_v25 }
 0x2e4   :  { %3049 = vmatpush3.msra.mxu1 %v4200_v13  ;;  %3007 = vmatprep.subr.mxu0 %v4747_v52  ;;  %v4767_v13 = vand.u32 4294901760, %v4734_v18 }
 0x2e5   :  { %3050 = vmatprep.subr.mxu1 %v4223_v0  ;;  %3008 = vmatpush3.msra.mxu0 %v4748_v5  ;;  %v4770_v0 = vand.u32 4294901760, %v4737_v17 }
 0x2e6   :  { %3051 = vmatpush3.msra.mxu1 %v4229_v2  ;;  %3009 = vmatprep.subr.mxu0 %v4749_v12  ;;  %v4753_v2 = vand.u32 4294901760, %v4208_v39  ;;  %v4768_v39 = vand.u32 4294901760, %v4735_v32 }
 0x2e7   :  { %3052 = vmatprep.subr.mxu1 %v4237_v56  ;;  %3010 = vmatpush3.msra.mxu0 %v4750_v19 }
 0x2e8   :  { %3053 = vmatpush3.msra.mxu1 %v4246_v46  ;;  %3011 = vmatprep.subr.mxu0 %v4751_v21 }
 0x2e9   :  { %3054 = vmatprep.subr.mxu1 %v4253_v51  ;;  %3012 = vmatpush3.msra.mxu0 %v4752_v22 }
 0x2ea   :  { %3055 = vmatpush3.msra.mxu1 %v4260_v53  ;;  %3013 = vmatprep.subr.mxu0 %v4753_v2  ;;  %v4757_v53 = vand.u32 4294901760, %v4717_v15 }
 0x2eb   :  { %3056 = vmatprep.subr.mxu1 %v4270_v55  ;;  %3014 = vmatpush3.msra.mxu0 %v4754_v42 }
 0x2ec   :  { %3057 = vmatpush3.msra.mxu1 %v4280_v38  ;;  %3015 = vmatprep.subr.mxu0 %v4755_v61  ;;  %v4761_v38 = vand.u32 4294901760, %v4725_v54 }
 0x2ed   :  { %3058 = vmatprep.subr.mxu1 %v4714_v26  ;;  %3016 = vmatpush3.msra.mxu0 %v4756_v63 }
 0x2ee   :  { %3059 = vmatpush3.msra.mxu1 %v4716_v60  ;;  %3017 = vmatprep.subr.mxu0 %v4757_v53 }
 0x2ef   :  { %3060 = vmatprep.subr.mxu1 %v4718_v20  ;;  %3018 = vmatpush3.msra.mxu0 %v4758_v43 }
 0x2f0   :  { %3061 = vmatpush3.msra.mxu1 %v4720_v40  ;;  %3019 = vmatprep.subr.mxu0 %v4759_v9 }
 0x2f1   :  { %3062 = vmatprep.subr.mxu1 %v4722_v28  ;;  %3020 = vmatpush3.msra.mxu0 %v4760_v16 }
 0x2f2   :  { %3063 = vmatpush3.msra.mxu1 %v4724_v49  ;;  %3021 = vmatprep.subr.mxu0 %v4761_v38 }
 0x2f3   :  { %3064 = vmatprep.subr.mxu1 %v4726_v59  ;;  %3022 = vmatpush3.msra.mxu0 %v4762_v47 }
 0x2f4   :  { %3065 = vmatpush3.msra.mxu1 %v4728_v34  ;;  %3023 = vmatprep.subr.mxu0 %v4763_v23 }
 0x2f5   :  { %2689 = vmatmul.mubr.f32.vlgmr.msra.gmra.mxu1 %v4399_v57  ;;  %3024 = vmatpush3.msra.mxu0 %v4764_v3 }
 0x2f6   :  { %3025 = vmatprep.subr.mxu0 %v4765_v10 }
 0x2f7   :  { %3026 = vmatpush3.msra.mxu0 %v4766_v41 }
 0x2f8   :  { %3027 = vmatprep.subr.mxu0 %v4767_v13 }
 0x2f9   :  { %3028 = vmatpush3.msra.mxu0 %v4768_v39 }
 0x2fa   :  { %3029 = vmatprep.subr.mxu0 %v4769_v30 }
 0x2fb   :  { %3030 = vmatpush3.msra.mxu0 %v4770_v0 }
 0x2fc   :  { %2585 = vmatmul.mubr.f32.vlgmr.msra.gmra.mxu0 %v4399_v57 }
 0x2fd   :  { %3347 = shalt.err (!%p3344_p9)
}
 0x2fe   :  { %2722 = dma.vmem_to_hbm [thread:$0]  %s2720_s24, 256, %s4598_s9, [#allocation7]  }
 0x2ff   :  { %s3412_s27 = smov [#allocation8]  }
 0x300   :  { %s2729_s28 = sshll.u32 %s3412_s27, 4  ;;  %s2730_s28 = int_to_ptr.vmem [resolvable:$true] %s2729_s28 }
 0x301   :  { %s3356_s29 = scalar_lea.vmem %s2730_s28, 256  ;;  %p3361_p11 = scmp.lt.s32.totalorder %s2730_s28, %s2730_s28 }
 0x302   :  { %p3357_p10 = scmp.ne.s32.totalorder %s2730_s28, %s3356_s29  ;;  %p3362_p12 = scmp.lt.s32.totalorder %s3356_s29, %s3356_s29 }
 0x304   :  { %p3363_p13 = por %p3362_p12, %p3361_p11 }
 0x306   :  { %p3364_p0 = pnand %p3363_p13, %p3357_p10 }
 0x308   :  { %3367 = shalt.err (!%p3364_p0)
}
 0x309   :  { %2732 = dma.vmem_to_hbm [thread:$0]  %s2730_s28, 256, %s4599_s10, [#allocation7]   ;;  %v4771_v49 = vld [vmem:[#allocation12_spill] sm:$0xff]  ;;  %v4772_v58 = vmov 0.0  }
 0x30a   :  { %vm2697_vm14 = vcmp.eq.s32.totalorder %v4771_v49, 16  ;;  %s3413_s9 = smov [#allocation5]  }
 0x30b   :  { %v2698_v24 = vsel %vm2697_vm14, 0.0625, %v4772_v58  ;;  %s2709_s10 = sshll.u32 %s3413_s9, 4  ;;  %s2710_s10 = int_to_ptr.vmem [resolvable:$true] %s2709_s10 }
 0x30c   :  { %s3376_s0 = scalar_lea.vmem %s2710_s10, 128  ;;  %p3381_p2 = scmp.lt.s32.totalorder %s2710_s10, %s2710_s10 }
 0x30d   :  { %p3377_p1 = scmp.ne.s32.totalorder %s2710_s10, %s3376_s0  ;;  %p3382_p3 = scmp.lt.s32.totalorder %s3376_s0, %s3376_s0 }
 0x30f   :  { %p3383_p4 = por %p3382_p3, %p3381_p2 }
 0x311   :  { %p3384_p5 = pnand %p3383_p4, %p3377_p1 }
 0x33e   :  { %v2696_v25 = vpop.xlane.xlu1 %2695 }
 0x33f   :  { %v2700_v18 = vmul.f32 %v2698_v24, %v2696_v25 }
 0x372   :  { %v2926_v46 = vpop.f32.mrf.mxu1 }
 0x374   :  { %v2927_v57 = vpop.f32.mrf.mxu1 }
 0x375   :  { %v2928_v26 = vadd.f32 %v2927_v57, %v2926_v46 }
 0x37a   :  { %v2891_v56 = vpop.f32.mrf.mxu0 }
 0x37c   :  { %v2892_v51 = vpop.f32.mrf.mxu0 }
 0x37d   :  { %v2893_v31 = vadd.f32 %v2892_v51, %v2891_v56 }
 0x37f   :  { %v2173_v15 = vadd.f32 %v2928_v26, %v2893_v31 }
 0x393   :  { %v2996_v27 = vpop.f32.mrf.mxu1 }
 0x395   :  { %v2997_v60 = vpop.f32.mrf.mxu1 }
 0x396   :  { %v2998_v14 = vadd.f32 %v2997_v60, %v2996_v27 }
 0x39b   :  { %v2961_v55 = vpop.f32.mrf.mxu0 }
 0x39d   :  { %v2962_v36 = vpop.f32.mrf.mxu0 }
 0x39e   :  { %v2963_v11 = vadd.f32 %v2962_v36, %v2961_v55 }
 0x3a0   :  { %v2311_v1 = vadd.f32 %v2963_v11, %v2173_v15 }
 0x3a2   :  { %v2419_v54 = vadd.f32 %v2998_v14, %v2311_v1 }
 0x3b5   :  { %v3066_v20 = vpop.f32.mrf.mxu1 }
 0x3b7   :  { %v3067_v28 = vpop.f32.mrf.mxu1 }
 0x3b8   :  { %v3068_v62 = vadd.f32 %v3067_v28, %v3066_v20 }
 0x3bc   :  { %v3031_v40 = vpop.f32.mrf.mxu0 }
 0x3be   :  { %v3032_v7 = vpop.f32.mrf.mxu0 }
 0x3bf   :  { %v3033_v59 = vadd.f32 %v3032_v7, %v3031_v40 }
 0x3c1   :  { %v2587_v34 = vadd.f32 %v3033_v59, %v2419_v54 }
 0x3c3   :  { %v2691_v4 = vadd.f32 %v3068_v62, %v2587_v34 }
 0x3c5   :  { %v2699_v32 = vmul.f32 -0.0625, %v2691_v4 }
 0x3c7   :  { %v2701_v37 = vadd.f32 %v2700_v18, %v2699_v32 }
 0x3c9   :  { %2702 = vst [vmem:[#allocation5] sm:$0xff] %v2701_v37 }
 0x3ca   :  { %3387 = shalt.err (!%p3384_p5)
}
 0x3cb   :  { %2712 = dma.vmem_to_hbm [thread:$0]  %s2710_s10, 128, %s4597_s8, [#allocation4]  }
 0x3cc   :  { %3398 = dma.done.wait [#allocation4], 128  }
 0x3cd   :  { %3399 = vsyncadd [#allocation4], 4294967168 }
 0x3ce   :  { %3400 = dma.done.wait [#allocation7], 512  }
 0x3cf   :  { %3401 = vsyncadd [#allocation7], 4294966784 }
 0x3d0   :  { %2742 = vsyncpa [#allocation3], 1 }
 0x3d1   :  { %2743 = vsyncpa [#allocation4], 1 }
 0x3d2   :  { %2744 = vsyncpa [#allocation7], 1 }

</bundles_post_ra>
